<compile_context>
chip_gen: v6e
topology: v6e:2x2x1
jax: 0.10.0
libtpu: 0.0.40
codegen_flags: <defaults>
</compile_context>

<pallas_src>
import functools

import jax
import jax.numpy as jnp
from jax.experimental import pallas as pl
from jax.experimental.pallas import tpu as pltpu


def _attention_head_kernel(f1_ref, f2_ref, bias_ref, seq_ref, o_ref, *, approx_recip):
    # f1_ref : (BB, 1, Np)   -- f1[b, j] + bf1, broadcast over rows
    # f2_ref : (BB, TM, 1)   -- f2[b, i] + bf2 for this row tile (pre-transposed)
    # bias_ref: (BB, TM, Np); seq_ref: (BB, Np, Np); o_ref: (BB, TM, Np)

    # logits[b, i, j] = f1[b, j] + f2[b, i]
    logits = f1_ref[...].astype(jnp.float32) + f2_ref[...].astype(jnp.float32)

    # leaky_relu (PyTorch default negative_slope = 0.01)
    lrelu = jnp.where(logits > 0, logits, 0.01 * logits)

    # row-wise softmax of (leaky_relu(logits) + bias_mat)
    z = lrelu + bias_ref[...].astype(jnp.float32)
    z = z - jnp.max(z, axis=-1, keepdims=True)
    e = jnp.exp(z)
    denom = jnp.sum(e, axis=-1, keepdims=True)
    coefs = e * pl.reciprocal(denom, approx=approx_recip)

    # vals = coefs @ seq_fts  -- dominant (batched) matmul, bf16 operands / f32 acc
    vals = jnp.einsum('bik,bkj->bij', coefs.astype(seq_ref.dtype), seq_ref[...],
                      preferred_element_type=jnp.float32)

    # ELU (alpha = 1.0). Clamp before exp so the inactive branch never overflows.
    neg = jnp.exp(jnp.minimum(vals, 0.0)) - 1.0
    o_ref[...] = jnp.where(vals > 0, vals, neg).astype(o_ref.dtype)


def _vmem_budget():
    """Generation-aware VMEM budget: (~capacity, ~75% limit). v7x-safe fallback."""
    cap = None
    try:
        cap = getattr(pltpu.get_tpu_info(), "vmem_capacity_bytes", None)
    except Exception:
        cap = None
    if not cap:
        cap = 64 * 1024 * 1024  # assume the smallest (v7x per-core) VMEM
    cap = int(cap)
    limit = min(cap * 3 // 4, 112 * 1024 * 1024)
    return cap, int(limit)


def attention_head_forward(x, edge_index, bias_mat, params, *,
                           matmul_dtype=jnp.bfloat16, bias_dtype=jnp.bfloat16,
                           out_dtype=None, block_rows=None):
    """x: (B, C_in, N), bias_mat: (B, N, N). edge_index is unused (as in PyTorch).

    params = (w1, wf1, bf1, wf2, bf2) with PyTorch-conv1x1 weights squeezed:
      w1: (C_out, C_in), wf1/wf2: (1, C_out), bf1/bf2: (1,)

    bias_dtype=bf16 is exact for the usual {0, -1e9} GAT adjacency mask; pass
    jnp.float32 if bias_mat carries arbitrary finite values.
    out_dtype=None keeps the reference semantics (same dtype as x).
    """
    del edge_index  # unused by the reference forward
    w1, wf1, bf1, wf2, bf2 = params
    B, C_in, N = x.shape
    C_out = w1.shape[0]
    assert C_out == N, "torch.matmul(coefs, seq_fts) in the reference requires out_channels == N"
    out_dtype = x.dtype if out_dtype is None else out_dtype

    # --- Tiny projections stay in XLA, with the f1/f2 weights folded through w1
    # so the f32 (B,N,N) seq_fts is never materialized or re-read from HBM. ---
    a1 = wf1[0] @ w1                                              # (C_in,)
    a2 = wf2[0] @ w1                                              # (C_in,)
    f1 = jnp.einsum('i,bin->bn', a1, x) + bf1[0]                  # (B, N), f32
    f2 = jnp.einsum('i,bin->bn', a2, x) + bf2[0]                  # (B, N), f32

    # seq_fts produced directly in the matmul dtype (bf16 feeds the MXU natively).
    seq_fts = jnp.einsum('oi,bin->bon', w1.astype(matmul_dtype), x.astype(matmul_dtype),
                         preferred_element_type=matmul_dtype)     # (B, N, N)

    # --- Pad node dims to a lane-dense multiple of 128 ---
    Np = ((N + 127) // 128) * 128
    pad = Np - N
    if pad:
        seq_fts = jnp.pad(seq_fts, ((0, 0), (0, pad), (0, pad)))          # padded rows are 0
        f1 = jnp.pad(f1, ((0, 0), (0, pad)))
        f2 = jnp.pad(f2, ((0, 0), (0, pad)))
        bias_mat = jnp.pad(bias_mat, ((0, 0), (0, pad), (0, pad)),
                           constant_values=-1e9)                          # mask padded columns
    # NOTE: a real row with *no* unmasked neighbour is degenerate in both the
    # reference and here (softmax over all-(-1e9) logits); typical GAT masks
    # never hit that case.

    f1 = f1[:, None, :]                      # (B, 1, Np)
    f2t = f2[:, :, None]                     # (B, Np, 1)  -- pre-transposed, no in-kernel XLU
    bias_mat = bias_mat.astype(bias_dtype)   # mask stream at half the HBM bytes

    vmem_cap, vmem_limit = _vmem_budget()

    # Row-tile: bigger amortizes the ~0.35 us/step overhead; 128 MiB parts can
    # afford 512-row bias/out tiles, v7x (64 MiB) keeps 256.
    if block_rows is None:
        if Np % 512 == 0 and vmem_cap >= 100 * 1024 * 1024:
            block_rows = 512
        elif Np % 256 == 0:
            block_rows = 256
        else:
            block_rows = 128
    tm = min(block_rows, Np)
    assert Np % tm == 0

    # Small graphs: pack several batches per grid step so the launch is not a
    # handful of sub-microsecond steps dominated by fixed per-step overhead.
    bb = 1
    if tm == Np and Np <= 256:
        for cand in (8, 4, 2):
            if B % cand == 0:
                bb = cand
                break

    # seq_fts is per-batch-tile resident; if double-buffering it would exceed the
    # VMEM budget (v7x at large Np) fall back to a single buffer -- its block
    # index only changes on the outer (batch) grid axis, so this merely exposes
    # DMA latency at batch boundaries.
    def _isz(dt):
        return jnp.dtype(dt).itemsize
    seq_block_bytes = bb * Np * Np * _isz(matmul_dtype)
    stream_bytes = 2 * bb * tm * Np * (_isz(bias_dtype) + _isz(out_dtype))
    single_buffer_seq = (2 * seq_block_bytes + stream_bytes) > vmem_limit
    # TODO(synk): add a K-tiled (flash-style) path for Np so large that even one
    # seq_fts buffer does not fit in VMEM.
    if single_buffer_seq:
        seq_spec = pl.BlockSpec((bb, Np, Np), lambda b, i: (b, 0, 0),
                                pipeline_mode=pl.Buffered(1))
    else:
        seq_spec = pl.BlockSpec((bb, Np, Np), lambda b, i: (b, 0, 0))

    approx = matmul_dtype != jnp.float32
    kernel = functools.partial(_attention_head_kernel, approx_recip=approx)

    out = pl.pallas_call(
        kernel,
        out_shape=jax.ShapeDtypeStruct((B, Np, Np), out_dtype),
        grid=(B // bb, Np // tm),
        in_specs=[
            pl.BlockSpec((bb, 1, Np), lambda b, i: (b, 0, 0)),     # f1 rows (per batch tile)
            pl.BlockSpec((bb, tm, 1), lambda b, i: (b, i, 0)),     # f2 column slice
            pl.BlockSpec((bb, tm, Np), lambda b, i: (b, i, 0)),    # bias_mat row tile (bf16)
            seq_spec,                                              # seq_fts (per batch tile)
        ],
        out_specs=pl.BlockSpec((bb, tm, Np), lambda b, i: (b, i, 0)),
        compiler_params=pltpu.CompilerParams(
            # batch axis first -> megacore sharding streams disjoint seq_fts per TC
            dimension_semantics=("parallel", "parallel"),
            vmem_limit_bytes=int(vmem_limit),
        ),
    )(f1, f2t, bias_mat, seq_fts)

    if pad:
        out = out[:, :N, :N]
    return out


def _reference(x, bias_mat, params):
    """Pure-JAX reference mirroring the PyTorch forward (dropout=0, residual=False)."""
    w1, wf1, bf1, wf2, bf2 = params
    seq_fts = jnp.einsum('oi,bin->bon', w1, x)                          # (B, C_out, N)
    f1 = jnp.einsum('co,bon->bcn', wf1, seq_fts) + bf1[None, :, None]   # (B, 1, N)
    f2 = jnp.einsum('co,bon->bcn', wf2, seq_fts) + bf2[None, :, None]   # (B, 1, N)
    logits = f1 + jnp.transpose(f2, (0, 2, 1))                          # (B, N, N)
    lrelu = jnp.where(logits > 0, logits, 0.01 * logits)
    coefs = jax.nn.softmax(lrelu + bias_mat, axis=-1)
    vals = jnp.matmul(coefs, seq_fts, precision=jax.lax.Precision.HIGHEST)
    return jnp.where(vals > 0, vals, jnp.exp(vals) - 1.0)


def _make_case(key, B, C_in, N):
    C_out = N
    k_x, k_b, k_w1, k_wf1, k_bf1, k_wf2, k_bf2 = jax.random.split(key, 7)
    x = jax.random.normal(k_x, (B, C_in, N), dtype=jnp.float32)
    bias_mat = jnp.where(jax.random.uniform(k_b, (B, N, N)) > 0.5, 0.0, -1e9).astype(jnp.float32)
    w1 = jax.random.normal(k_w1, (C_out, C_in), dtype=jnp.float32) * 0.2
    wf1 = jax.random.normal(k_wf1, (1, C_out), dtype=jnp.float32) * 0.2
    bf1 = jax.random.normal(k_bf1, (1,), dtype=jnp.float32) * 0.1
    wf2 = jax.random.normal(k_wf2, (1, C_out), dtype=jnp.float32) * 0.2
    bf2 = jax.random.normal(k_bf2, (1,), dtype=jnp.float32) * 0.1
    return x, bias_mat, (w1, wf1, bf1, wf2, bf2)


if __name__ == "__main__":
    key = jax.random.PRNGKey(0)
    k1, k2, k3 = jax.random.split(key, 3)
    edge_index = jnp.zeros((2, 16), dtype=jnp.int32)  # unused by forward, kept for signature parity

    # Case 1: lane-dense N (multiple of 128); both batches packed into one grid step.
    B, C_in, N = 2, 4, 128
    x, bias_mat, params = _make_case(k1, B, C_in, N)
    ref = _reference(x, bias_mat, params)

    out_bf16 = jax.block_until_ready(attention_head_forward(x, edge_index, bias_mat, params))
    assert out_bf16.shape == (B, N, N)
    assert jnp.allclose(out_bf16, ref, atol=2e-2, rtol=2e-2), "bf16-path mismatch vs reference"

    out_f32 = jax.block_until_ready(
        attention_head_forward(x, edge_index, bias_mat, params, matmul_dtype=jnp.float32))
    assert jnp.allclose(out_f32, ref, atol=1e-2, rtol=1e-2), "f32-path mismatch vs reference"

    # Case 2: N not a multiple of 128 exercises the lane-padding path.
    B2, C_in2, N2 = 2, 4, 96
    x2, bias_mat2, params2 = _make_case(k2, B2, C_in2, N2)
    ref2 = _reference(x2, bias_mat2, params2)
    out2 = jax.block_until_ready(attention_head_forward(x2, edge_index, bias_mat2, params2))
    assert out2.shape == (B2, N2, N2)
    assert jnp.allclose(out2, ref2, atol=2e-2, rtol=2e-2), "padded-path mismatch vs reference"

    # Case 3: row-tiled path (tm < Np), single batch per grid step.
    B3, C_in3, N3 = 1, 4, 256
    x3, bias_mat3, params3 = _make_case(k3, B3, C_in3, N3)
    ref3 = _reference(x3, bias_mat3, params3)
    out3 = jax.block_until_ready(
        attention_head_forward(x3, edge_index, bias_mat3, params3, block_rows=128))
    assert out3.shape == (B3, N3, N3)
    assert jnp.allclose(out3, ref3, atol=2e-2, rtol=2e-2), "row-tiled-path mismatch vs reference"

    print("KERNEL_OK")
</pallas_src>

<mosaic_0001>
module attributes {stable_mosaic.version = 11 : i64} {
  func.func @_attention_head_kernel(%arg0: i32, %arg1: i32, %arg2: memref<2x1x128xf32, #tpu.memory_space<vmem>>, %arg3: memref<2x128x1xf32, #tpu.memory_space<vmem>>, %arg4: memref<2x128x128xbf16, #tpu.memory_space<vmem>>, %arg5: memref<2x128x128xbf16, #tpu.memory_space<vmem>>, %arg6: memref<2x128x128xf32, #tpu.memory_space<vmem>>) attributes {dimension_semantics = [#tpu.dimension_semantics<parallel>, #tpu.dimension_semantics<parallel>], iteration_bounds = array<i64: 1, 1>, scalar_prefetch = 0 : i64, scratch_operands = 0 : i64, tpu.core_type = #tpu.core_type<tc>, window_params = [{transform_indices = @transform_0, window_bounds = array<i64: 2, 1, 128>}, {transform_indices = @transform_1, window_bounds = array<i64: 2, 128, 1>}, {transform_indices = @transform_2, window_bounds = array<i64: 2, 128, 128>}, {transform_indices = @transform_3, window_bounds = array<i64: 2, 128, 128>}, {transform_indices = @transform_4, window_bounds = array<i64: 2, 128, 128>}]} {
    %c0 = arith.constant 0 : index
    %c0_0 = arith.constant 0 : index
    %c0_1 = arith.constant 0 : index
    %0 = vector.load %arg2[%c0, %c0_0, %c0_1] : memref<2x1x128xf32, #tpu.memory_space<vmem>>, vector<2x1x128xf32>
    %c0_2 = arith.constant 0 : index
    %c0_3 = arith.constant 0 : index
    %c0_4 = arith.constant 0 : index
    %1 = vector.load %arg3[%c0_2, %c0_3, %c0_4] : memref<2x128x1xf32, #tpu.memory_space<vmem>>, vector<2x128x1xf32>
    %2 = vector.broadcast %0 : vector<2x1x128xf32> to vector<2x128x128xf32>
    %3 = vector.broadcast %1 : vector<2x128x1xf32> to vector<2x128x128xf32>
    %4 = arith.addf %2, %3 : vector<2x128x128xf32>
    %cst = arith.constant 0.000000e+00 : f32
    %5 = vector.broadcast %cst : f32 to vector<2x128x128xf32>
    %6 = arith.cmpf ogt, %4, %5 : vector<2x128x128xf32>
    %cst_5 = arith.constant 0.00999999977 : f32
    %7 = vector.broadcast %cst_5 : f32 to vector<2x128x128xf32>
    %8 = arith.mulf %7, %4 : vector<2x128x128xf32>
    %9 = arith.select %6, %4, %8 : vector<2x128x128xi1>, vector<2x128x128xf32>
    %c0_6 = arith.constant 0 : index
    %c0_7 = arith.constant 0 : index
    %c0_8 = arith.constant 0 : index
    %10 = vector.load %arg4[%c0_6, %c0_7, %c0_8] : memref<2x128x128xbf16, #tpu.memory_space<vmem>>, vector<2x128x128xbf16>
    %11 = arith.extf %10 : vector<2x128x128xbf16> to vector<2x128x128xf32>
    %12 = arith.addf %9, %11 : vector<2x128x128xf32>
    %cst_9 = arith.constant dense<0xFF800000> : vector<2x128xf32>
    %13 = vector.multi_reduction <maximumf>, %12, %cst_9 [2] : vector<2x128x128xf32> to vector<2x128xf32>
    %14 = vector.shape_cast %13 : vector<2x128xf32> to vector<2x128x1xf32>
    %15 = vector.broadcast %14 : vector<2x128x1xf32> to vector<2x128x128xf32>
    %16 = arith.subf %12, %15 : vector<2x128x128xf32>
    %17 = math.exp %16 : vector<2x128x128xf32>
    %cst_10 = arith.constant dense<0.000000e+00> : vector<2x128xf32>
    %18 = vector.multi_reduction <add>, %17, %cst_10 [2] : vector<2x128x128xf32> to vector<2x128xf32>
    %19 = vector.shape_cast %18 : vector<2x128xf32> to vector<2x128x1xf32>
    %20 = tpu.reciprocal %19 {approx = true} : vector<2x128x1xf32> -> vector<2x128x1xf32>
    %21 = vector.broadcast %20 : vector<2x128x1xf32> to vector<2x128x128xf32>
    %22 = arith.mulf %17, %21 : vector<2x128x128xf32>
    %23 = arith.truncf %22 : vector<2x128x128xf32> to vector<2x128x128xbf16>
    %c0_11 = arith.constant 0 : index
    %c0_12 = arith.constant 0 : index
    %c0_13 = arith.constant 0 : index
    %24 = vector.load %arg5[%c0_11, %c0_12, %c0_13] : memref<2x128x128xbf16, #tpu.memory_space<vmem>>, vector<2x128x128xbf16>
    "tpu.trace_start"() <{level = 10 : i32, message = "bik,bkj->bij"}> : () -> ()
    %cst_14 = arith.constant dense<0.000000e+00> : vector<2x128x128xf32>
    %25 = tpu.matmul %23, %24, %cst_14 {dimension_numbers = #tpu.dot_dimension_numbers<[2], [1], [1], [2], [0, 0, 0, 1, 1, 2], [0], [0]>} : vector<2x128x128xbf16>, vector<2x128x128xbf16>, vector<2x128x128xf32> -> vector<2x128x128xf32>
    "tpu.trace_stop"() : () -> ()
    %cst_15 = arith.constant 0.000000e+00 : f32
    %26 = vector.broadcast %cst_15 : f32 to vector<2x128x128xf32>
    %27 = arith.minimumf %25, %26 : vector<2x128x128xf32>
    %28 = math.exp %27 : vector<2x128x128xf32>
    %cst_16 = arith.constant 1.000000e+00 : f32
    %29 = vector.broadcast %cst_16 : f32 to vector<2x128x128xf32>
    %30 = arith.subf %28, %29 : vector<2x128x128xf32>
    %cst_17 = arith.constant 0.000000e+00 : f32
    %31 = vector.broadcast %cst_17 : f32 to vector<2x128x128xf32>
    %32 = arith.cmpf ogt, %25, %31 : vector<2x128x128xf32>
    %33 = arith.select %32, %25, %30 : vector<2x128x128xi1>, vector<2x128x128xf32>
    %c0_18 = arith.constant 0 : index
    %c0_19 = arith.constant 0 : index
    %c0_20 = arith.constant 0 : index
    %34 = vector.load %arg6[%c0_18, %c0_19, %c0_20] : memref<2x128x128xf32, #tpu.memory_space<vmem>>, vector<2x128x128xf32>
    tpu.vector_store %arg6[%c0_18, %c0_19, %c0_20], %33 {strides = array<i32>} : memref<2x128x128xf32, #tpu.memory_space<vmem>>, vector<2x128x128xf32>,
    return
  }
  func.func @transform_0(%arg0: i32, %arg1: i32) -> (i32, i32, i32) {
    %c0_i32 = arith.constant 0 : i32
    %c0_i32_0 = arith.constant 0 : i32
    %c0_i32_1 = arith.constant 0 : i32
    return %arg0, %c0_i32, %c0_i32_0 : i32, i32, i32
  }
  func.func @transform_1(%arg0: i32, %arg1: i32) -> (i32, i32, i32) {
    %c0_i32 = arith.constant 0 : i32
    %c0_i32_0 = arith.constant 0 : i32
    return %arg0, %arg1, %c0_i32 : i32, i32, i32
  }
  func.func @transform_2(%arg0: i32, %arg1: i32) -> (i32, i32, i32) {
    %c0_i32 = arith.constant 0 : i32
    %c0_i32_0 = arith.constant 0 : i32
    return %arg0, %arg1, %c0_i32 : i32, i32, i32
  }
  func.func @transform_3(%arg0: i32, %arg1: i32) -> (i32, i32, i32) {
    %c0_i32 = arith.constant 0 : i32
    %c0_i32_0 = arith.constant 0 : i32
    %c0_i32_1 = arith.constant 0 : i32
    return %arg0, %c0_i32, %c0_i32_0 : i32, i32, i32
  }
  func.func @transform_4(%arg0: i32, %arg1: i32) -> (i32, i32, i32) {
    %c0_i32 = arith.constant 0 : i32
    %c0_i32_0 = arith.constant 0 : i32
    return %arg0, %arg1, %c0_i32 : i32, i32, i32
  }
}

</mosaic_0001>

<bundles_post_ra>
// kernel: tpu_custom_call.1
= control target key start
LH: loop header
LB: loop body
LE: loop exit
PB: predicated region body
PF: predicated region fallthrough
CT: control target
= control target key end

     0   :  { %v1776_v2 = vmov 0   ;;  %s2465_s0 = inlined_call_operand.vmem [shape: f32[2,1,128], index: 0, kind: input, shape index: {}]   ;;  %s2466_s1 = inlined_call_operand.vmem [shape: f32[2,128,1], index: 1, kind: input, shape index: {}]   ;;  %s2467_s2 = inlined_call_operand.vmem [shape: bf16[2,128,128], index: 2, kind: input, shape index: {}]   ;;  %s2468_s3 = inlined_call_operand.vmem [shape: bf16[2,128,128], index: 3, kind: input, shape index: {}]   ;;  %s2469_s4 = inlined_call_operand.hbm [shape: f32[2,128,128], index: 4, kind: output, shape index: {}]  }
   0x1   :  { %v37_v0 = vld [vmem:[%s2466_s1 + $0x80] sm:$0xff]  ;;  %1545 = vset.pattern.permute.xlu1 %v1776_v2  ;;  %1544 = vset.pattern.permute.xlu0 %v1776_v2  ;;  %v38_v3 = vld [vmem:[%s2466_s1 + $0x88] sm:$0xff]  ;;  %v24_v5 = vld [vmem:[%s2466_s1 + $0x18] sm:$0xff] }
   0x2   :  { %v21_v1 = vld [vmem:[%s2466_s1] sm:$0xff]  ;;  %147 = vperm.xlu1 %1545, %v37_v0   ;;  %v22_v4 = vld [vmem:[%s2466_s1 + $0x8] sm:$0xff]  ;;  %v23_v6 = vld [vmem:[%s2466_s1 + $0x10] sm:$0xff] }
   0x3   :  { %67 = vperm.xlu0 %1544, %v21_v1   ;;  %v40_v7 = vld [vmem:[%s2466_s1 + $0x98] sm:$0xff]  ;;  %v39_v8 = vld [vmem:[%s2466_s1 + $0x90] sm:$0xff]  ;;  %v26_v9 = vld [vmem:[%s2466_s1 + $0x28] sm:$0xff] }
   0x4   :  { %v25_v10 = vld [vmem:[%s2466_s1 + $0x20] sm:$0xff]  ;;  %v42_v11 = vld [vmem:[%s2466_s1 + $0xa8] sm:$0xff]  ;;  %v28_v13 = vld [vmem:[%s2466_s1 + $0x38] sm:$0xff] }
   0x5   :  { %v41_v12 = vld [vmem:[%s2466_s1 + $0xa0] sm:$0xff]  ;;  %v27_v14 = vld [vmem:[%s2466_s1 + $0x30] sm:$0xff] }
   0x6   :  { %152 = vperm.xlu1 %1545, %v38_v3  }
   0x7   :  { %72 = vperm.xlu0 %1544, %v22_v4  }
   0xa   :  { %82 = vperm.xlu1 %1545, %v24_v5  }
   0xb   :  { %77 = vperm.xlu0 %1544, %v23_v6  }
   0xe   :  { %162 = vperm.xlu1 %1545, %v40_v7  }
   0xf   :  { %157 = vperm.xlu0 %1544, %v39_v8  }
  0x12   :  { %92 = vperm.xlu1 %1545, %v26_v9  }
  0x13   :  { %87 = vperm.xlu0 %1544, %v25_v10  }
  0x16   :  { %172 = vperm.xlu1 %1545, %v42_v11  }
  0x17   :  { %167 = vperm.xlu0 %1544, %v41_v12  }
  0x18   :  { %9 = vsyncpa [#allocation3], 0  ;;  %v44_v15 = vld [vmem:[%s2466_s1 + $0xb8] sm:$0xff]  ;;  %v43_v16 = vld [vmem:[%s2466_s1 + $0xb0] sm:$0xff] }
  0x19   :  { %v30_v17 = vld [vmem:[%s2466_s1 + $0x48] sm:$0xff]  ;;  %v29_v18 = vld [vmem:[%s2466_s1 + $0x40] sm:$0xff]  ;;  %v32_v21 = vld [vmem:[%s2466_s1 + $0x58] sm:$0xff] }
  0x1a   :  { %102 = vperm.xlu1 %1545, %v28_v13   ;;  %v46_v19 = vld [vmem:[%s2466_s1 + $0xc8] sm:$0xff]  ;;  %v45_v20 = vld [vmem:[%s2466_s1 + $0xc0] sm:$0xff]  ;;  %v31_v22 = vld [vmem:[%s2466_s1 + $0x50] sm:$0xff] }
  0x1b   :  { %97 = vperm.xlu0 %1544, %v27_v14   ;;  %v48_v23 = vld [vmem:[%s2466_s1 + $0xd8] sm:$0xff]  ;;  %v47_v24 = vld [vmem:[%s2466_s1 + $0xd0] sm:$0xff]  ;;  %v34_v25 = vld [vmem:[%s2466_s1 + $0x68] sm:$0xff] }
  0x1c   :  { %v33_v26 = vld [vmem:[%s2466_s1 + $0x60] sm:$0xff]  ;;  %v50_v27 = vld [vmem:[%s2466_s1 + $0xe8] sm:$0xff]  ;;  %v36_v29 = vld [vmem:[%s2466_s1 + $0x78] sm:$0xff] }
  0x1d   :  { %v49_v28 = vld [vmem:[%s2466_s1 + $0xe0] sm:$0xff]  ;;  %v35_v30 = vld [vmem:[%s2466_s1 + $0x70] sm:$0xff]  ;;  %v52_v31 = vld [vmem:[%s2466_s1 + $0xf8] sm:$0xff] }
  0x1e   :  { %182 = vperm.xlu1 %1545, %v44_v15   ;;  %v51_v32 = vld [vmem:[%s2466_s1 + $0xf0] sm:$0xff]  ;;  %v1904_v33 = vld [vmem:[%s2465_s0 + $0x1] ss:$0 sm:$0xff]  ;;  %v1909_v34 = vld [vmem:[%s2465_s0] ss:$0 sm:$0xff] }
  0x1f   :  { %177 = vperm.xlu0 %1544, %v43_v16   ;;  %v1366_v35 = vld [vmem:[%s2467_s2] sm:$0xff]   ;;  %v1429_v55 = vld [vmem:[%s2467_s2 + $0x8] sm:$0xff]  }
  0x20   :  { %v1367_v40 = vunpack.c.l.bf16 %v1366_v35  ;;  %v1436_v43 = vld [vmem:[%s2467_s2 + $0x40] sm:$0xff]   ;;  %v1368_v50 = vunpack.c.h.bf16 %v1366_v35  ;;  %v1371_v63 = vunpack.c.l.bf16 %v1429_v55  ;;  %v1437_v4 = vld [vmem:[%s2467_s2 + $0x48] sm:$0xff]   ;;  %v1372_v13 = vunpack.c.h.bf16 %v1429_v55 }
  0x21   :  { %v1399_v51 = vunpack.c.l.bf16 %v1436_v43  ;;  %v1400_v0 = vunpack.c.h.bf16 %v1436_v43  ;;  %v1403_v12 = vunpack.c.l.bf16 %v1437_v4 }
  0x22   :  { %112 = vperm.xlu1 %1545, %v30_v17   ;;  %v1430_v17 = vld [vmem:[%s2467_s2 + $0x10] sm:$0xff]  }
  0x23   :  { %107 = vperm.xlu0 %1544, %v29_v18  }
  0x26   :  { %192 = vperm.xlu1 %1545, %v46_v19  }
  0x27   :  { %187 = vperm.xlu0 %1544, %v45_v20  }
  0x2a   :  { %122 = vperm.xlu1 %1545, %v32_v21  }
  0x2b   :  { %117 = vperm.xlu0 %1544, %v31_v22  }
  0x2e   :  { %202 = vperm.xlu1 %1545, %v48_v23  }
  0x2f   :  { %197 = vperm.xlu0 %1544, %v47_v24  }
  0x32   :  { %132 = vperm.xlu1 %1545, %v34_v25   ;;  %v1375_v25 = vunpack.c.l.bf16 %v1430_v17 }
  0x33   :  { %127 = vperm.xlu0 %1544, %v33_v26   ;;  %v1404_v26 = vunpack.c.h.bf16 %v1437_v4 }
  0x36   :  { %212 = vperm.xlu1 %1545, %v50_v27  }
  0x37   :  { %207 = vperm.xlu0 %1544, %v49_v28  }
  0x3a   :  { %142 = vperm.xlu1 %1545, %v36_v29  }
  0x3b   :  { %137 = vperm.xlu0 %1544, %v35_v30   ;;  %v1438_v30 = vld [vmem:[%s2467_s2 + $0x50] sm:$0xff]  }
  0x3c   :  { %v1408_v55 = vunpack.c.h.bf16 %v1438_v30 }
  0x3e   :  { %222 = vperm.xlu1 %1545, %v52_v31  }
  0x3f   :  { %217 = vperm.xlu0 %1544, %v51_v32  }
  0x7d   :  { %v148_v36 = vpop.permute.xlu1 %147 }
  0x7e   :  { %v68_v37 = vpop.permute.xlu0 %67  ;;  %v241_v38 = vadd.f32 %v1904_v33, %v148_v36 }
  0x7f   :  { %v225_v39 = vadd.f32 %v1909_v34, %v68_v37 }
  0x80   :  { %v305_v41 = vmul.f32 0.01, %v241_v38  ;;  %vm273_vm1 = vcmp.gt.f32.partialorder %v241_v38, 0.0 }
  0x81   :  { %v289_v42 = vmul.f32 0.01, %v225_v39  ;;  %vm257_vm0 = vcmp.gt.f32.partialorder %v225_v39, 0.0  ;;  %v153_v44 = vpop.permute.xlu1 %152 }
  0x82   :  { %v73_v45 = vpop.permute.xlu0 %72  ;;  %v242_v46 = vadd.f32 %v1904_v33, %v153_v44  ;;  %v337_v54 = vsel %vm273_vm1, %v241_v38, %v305_v41  ;;  %v1376_v41 = vunpack.c.h.bf16 %v1430_v17 }
  0x83   :  { %v226_v47 = vadd.f32 %v1909_v34, %v73_v45  ;;  %v321_v48 = vsel %vm257_vm0, %v225_v39, %v289_v42  ;;  %v1931_v62 = vadd.f32 %v1399_v51, %v337_v54  ;;  %v1431_v45 = vld [vmem:[%s2467_s2 + $0x18] sm:$0xff]  }
  0x84   :  { %v1921_v49 = vadd.f32 %v1367_v40, %v321_v48  ;;  %v306_v52 = vmul.f32 0.01, %v242_v46  ;;  %vm274_vm3 = vcmp.gt.f32.partialorder %v242_v46, 0.0  ;;  %v1407_v40 = vunpack.c.l.bf16 %v1438_v30 }
  0x85   :  { %v290_v53 = vmul.f32 0.01, %v226_v47  ;;  %vm258_vm2 = vcmp.gt.f32.partialorder %v226_v47, 0.0  ;;  %v83_v56 = vpop.permute.xlu1 %82  ;;  %v1379_v54 = vunpack.c.l.bf16 %v1431_v45 }
  0x86   :  { %v78_v57 = vpop.permute.xlu0 %77  ;;  %449 = vmax.xlane.f32.xlu0 %v1921_v49  ;;  %v228_v58 = vadd.f32 %v1909_v34, %v83_v56  ;;  %v338_v3 = vsel %vm274_vm3, %v242_v46, %v306_v52 }
  0x87   :  { %v227_v59 = vadd.f32 %v1909_v34, %v78_v57  ;;  %v322_v60 = vsel %vm258_vm2, %v226_v47, %v290_v53  ;;  %v1942_v11 = vadd.f32 %v1400_v0, %v338_v3 }
  0x88   :  { %v1929_v61 = vadd.f32 %v1368_v50, %v322_v60  ;;  %v292_v1 = vmul.f32 0.01, %v228_v58  ;;  %vm260_vm5 = vcmp.gt.f32.partialorder %v228_v58, 0.0 }
  0x89   :  { %v291_v2 = vmul.f32 0.01, %v227_v59  ;;  %vm259_vm4 = vcmp.gt.f32.partialorder %v227_v59, 0.0  ;;  %v163_v5 = vpop.permute.xlu1 %162 }
  0x8a   :  { %v158_v6 = vpop.permute.xlu0 %157  ;;  %451 = vmax.xlane.f32.xlu1 %v1929_v61  ;;  %481 = vmax.xlane.f32.xlu0 %v1931_v62  ;;  %v244_v7 = vadd.f32 %v1904_v33, %v163_v5  ;;  %v324_v16 = vsel %vm260_vm5, %v228_v58, %v292_v1 }
  0x8b   :  { %v243_v8 = vadd.f32 %v1904_v33, %v158_v6  ;;  %v323_v9 = vsel %vm259_vm4, %v227_v59, %v291_v2  ;;  %v1953_v24 = vadd.f32 %v1372_v13, %v324_v16  ;;  %v1439_v59 = vld [vmem:[%s2467_s2 + $0x58] sm:$0xff]   ;;  %v1380_v6 = vunpack.c.h.bf16 %v1431_v45 }
  0x8c   :  { %v1940_v10 = vadd.f32 %v1371_v63, %v323_v9  ;;  %v308_v14 = vmul.f32 0.01, %v244_v7  ;;  %vm276_vm7 = vcmp.gt.f32.partialorder %v244_v7, 0.0  ;;  %v1411_v5 = vunpack.c.l.bf16 %v1439_v59 }
  0x8d   :  { %v307_v15 = vmul.f32 0.01, %v243_v8  ;;  %vm275_vm6 = vcmp.gt.f32.partialorder %v243_v8, 0.0  ;;  %v93_v18 = vpop.permute.xlu1 %92 }
  0x8e   :  { %v88_v19 = vpop.permute.xlu0 %87  ;;  %453 = vmax.xlane.f32.xlu1 %v1940_v10  ;;  %483 = vmax.xlane.f32.xlu0 %v1942_v11  ;;  %v230_v20 = vadd.f32 %v1909_v34, %v93_v18  ;;  %v340_v29 = vsel %vm276_vm7, %v244_v7, %v308_v14 }
  0x8f   :  { %v229_v21 = vadd.f32 %v1909_v34, %v88_v19  ;;  %v339_v22 = vsel %vm275_vm6, %v243_v8, %v307_v15  ;;  %v1964_v39 = vadd.f32 %v1404_v26, %v340_v29 }
  0x90   :  { %v1951_v23 = vadd.f32 %v1403_v12, %v339_v22  ;;  %v294_v27 = vmul.f32 0.01, %v230_v20  ;;  %vm262_vm9 = vcmp.gt.f32.partialorder %v230_v20, 0.0  ;;  %v1432_v12 = vld [vmem:[%s2467_s2 + $0x20] sm:$0xff]  }
  0x91   :  { %v293_v28 = vmul.f32 0.01, %v229_v21  ;;  %vm261_vm8 = vcmp.gt.f32.partialorder %v229_v21, 0.0  ;;  %v173_v31 = vpop.permute.xlu1 %172 }
  0x92   :  { %v168_v32 = vpop.permute.xlu0 %167  ;;  %485 = vmax.xlane.f32.xlu1 %v1951_v23  ;;  %455 = vmax.xlane.f32.xlu0 %v1953_v24  ;;  %v246_v35 = vadd.f32 %v1904_v33, %v173_v31  ;;  %v326_v44 = vsel %vm262_vm9, %v230_v20, %v294_v27  ;;  %v1383_v20 = vunpack.c.l.bf16 %v1432_v12  ;;  %v1440_v27 = vld [vmem:[%s2467_s2 + $0x60] sm:$0xff]  }
  0x93   :  { %v245_v36 = vadd.f32 %v1904_v33, %v168_v32  ;;  %v325_v37 = vsel %vm261_vm8, %v229_v21, %v293_v28  ;;  %v1975_v53 = vadd.f32 %v1376_v41, %v326_v44  ;;  %v1412_v21 = vunpack.c.h.bf16 %v1439_v59  ;;  %v1433_v44 = vld [vmem:[%s2467_s2 + $0x28] sm:$0xff]  }
  0x94   :  { %v1962_v38 = vadd.f32 %v1375_v25, %v325_v37  ;;  %v310_v42 = vmul.f32 0.01, %v246_v35  ;;  %vm278_vm11 = vcmp.gt.f32.partialorder %v246_v35, 0.0  ;;  %v1415_v37 = vunpack.c.l.bf16 %v1440_v27 }
  0x95   :  { %v309_v43 = vmul.f32 0.01, %v245_v36  ;;  %vm277_vm10 = vcmp.gt.f32.partialorder %v245_v36, 0.0  ;;  %v103_v46 = vpop.permute.xlu1 %102 }
  0x96   :  { %v98_v47 = vpop.permute.xlu0 %97  ;;  %457 = vmax.xlane.f32.xlu1 %v1962_v38  ;;  %487 = vmax.xlane.f32.xlu0 %v1964_v39  ;;  %v232_v48 = vadd.f32 %v1909_v34, %v103_v46  ;;  %v342_v58 = vsel %vm278_vm11, %v246_v35, %v310_v42 }
  0x97   :  { %v231_v50 = vadd.f32 %v1909_v34, %v98_v47  ;;  %v341_v51 = vsel %vm277_vm10, %v245_v36, %v309_v43  ;;  %v1986_v4 = vadd.f32 %v1408_v55, %v342_v58  ;;  %v1387_v55 = vunpack.c.l.bf16 %v1433_v44 }
  0x98   :  { %v1973_v52 = vadd.f32 %v1407_v40, %v341_v51  ;;  %v296_v56 = vmul.f32 0.01, %v232_v48  ;;  %vm264_vm13 = vcmp.gt.f32.partialorder %v232_v48, 0.0  ;;  %v1384_v40 = vunpack.c.h.bf16 %v1432_v12 }
  0x99   :  { %v295_v57 = vmul.f32 0.01, %v231_v50  ;;  %vm263_vm12 = vcmp.gt.f32.partialorder %v231_v50, 0.0  ;;  %v183_v60 = vpop.permute.xlu1 %182 }
  0x9a   :  { %v178_v63 = vpop.permute.xlu0 %177  ;;  %489 = vmax.xlane.f32.xlu1 %v1973_v52  ;;  %459 = vmax.xlane.f32.xlu0 %v1975_v53  ;;  %v248_v0 = vadd.f32 %v1904_v33, %v183_v60  ;;  %v328_v9 = vsel %vm264_vm13, %v232_v48, %v296_v56  ;;  %v1416_v56 = vunpack.c.h.bf16 %v1440_v27  ;;  %v1441_v60 = vld [vmem:[%s2467_s2 + $0x68] sm:$0xff]  }
  0x9b   :  { %v247_v1 = vadd.f32 %v1904_v33, %v178_v63  ;;  %v327_v2 = vsel %vm263_vm12, %v231_v50, %v295_v57  ;;  %v1997_v19 = vadd.f32 %v1380_v6, %v328_v9  ;;  %v1388_v9 = vunpack.c.h.bf16 %v1433_v44 }
  0x9c   :  { %v1984_v3 = vadd.f32 %v1379_v54, %v327_v2  ;;  %v312_v7 = vmul.f32 0.01, %v248_v0  ;;  %vm280_vm15 = vcmp.gt.f32.partialorder %v248_v0, 0.0 }
  0x9d   :  { %v311_v8 = vmul.f32 0.01, %v247_v1  ;;  %vm279_vm14 = vcmp.gt.f32.partialorder %v247_v1, 0.0  ;;  %v113_v13 = vpop.permute.xlu1 %112 }
  0x9e   :  { %v108_v14 = vpop.permute.xlu0 %107  ;;  %461 = vmax.xlane.f32.xlu1 %v1984_v3  ;;  %491 = vmax.xlane.f32.xlu0 %v1986_v4  ;;  %v234_v15 = vadd.f32 %v1909_v34, %v113_v13  ;;  %v344_v26 = vsel %vm280_vm15, %v248_v0, %v312_v7 }
  0x9f   :  { %v233_v16 = vadd.f32 %v1909_v34, %v108_v14  ;;  %v343_v17 = vsel %vm279_vm14, %v247_v1, %v311_v8  ;;  %v2008_v36 = vadd.f32 %v1412_v21, %v344_v26  ;;  %v1419_v8 = vunpack.c.l.bf16 %v1441_v60 }
  0xa0   :  { %v1995_v18 = vadd.f32 %v1411_v5, %v343_v17  ;;  %v298_v22 = vmul.f32 0.01, %v234_v15  ;;  %vm266_vm1 = vcmp.gt.f32.partialorder %v234_v15, 0.0 }
  0xa1   :  { %v297_v25 = vmul.f32 0.01, %v233_v16  ;;  %vm265_vm0 = vcmp.gt.f32.partialorder %v233_v16, 0.0  ;;  %v193_v28 = vpop.permute.xlu1 %192 }
  0xa2   :  { %v188_v29 = vpop.permute.xlu0 %187  ;;  %493 = vmax.xlane.f32.xlu1 %v1995_v18  ;;  %463 = vmax.xlane.f32.xlu0 %v1997_v19  ;;  %v250_v30 = vadd.f32 %v1904_v33, %v193_v28  ;;  %v330_v43 = vsel %vm266_vm1, %v234_v15, %v298_v22  ;;  %v1434_v15 = vld [vmem:[%s2467_s2 + $0x30] sm:$0xff]   ;;  %v1420_v28 = vunpack.c.h.bf16 %v1441_v60 }
  0xa3   :  { %v249_v31 = vadd.f32 %v1904_v33, %v188_v29  ;;  %v329_v32 = vsel %vm265_vm0, %v233_v16, %v297_v25  ;;  %v2019_v54 = vadd.f32 %v1384_v40, %v330_v43  ;;  %v1391_v27 = vunpack.c.l.bf16 %v1434_v15 }
  0xa4   :  { %v2006_v35 = vadd.f32 %v1383_v20, %v329_v32  ;;  %v314_v41 = vmul.f32 0.01, %v250_v30  ;;  %vm282_vm3 = vcmp.gt.f32.partialorder %v250_v30, 0.0  ;;  %v1442_v32 = vld [vmem:[%s2467_s2 + $0x70] sm:$0xff]  }
  0xa5   :  { %v313_v42 = vmul.f32 0.01, %v249_v31  ;;  %vm281_vm2 = vcmp.gt.f32.partialorder %v249_v31, 0.0  ;;  %v123_v45 = vpop.permute.xlu1 %122 }
  0xa6   :  { %v118_v46 = vpop.permute.xlu0 %117  ;;  %465 = vmax.xlane.f32.xlu1 %v2006_v35  ;;  %495 = vmax.xlane.f32.xlu0 %v2008_v36  ;;  %v236_v47 = vadd.f32 %v1909_v34, %v123_v45  ;;  %v346_v59 = vsel %vm282_vm3, %v250_v30, %v314_v41 }
  0xa7   :  { %v235_v48 = vadd.f32 %v1909_v34, %v118_v46  ;;  %v345_v50 = vsel %vm281_vm2, %v249_v31, %v313_v42  ;;  %v2030_v7 = vadd.f32 %v1416_v56, %v346_v59  ;;  %v1423_v46 = vunpack.c.l.bf16 %v1442_v32  ;;  %v1435_v56 = vld [vmem:[%s2467_s2 + $0x38] sm:$0xff]  }
  0xa8   :  { %v2017_v51 = vadd.f32 %v1415_v37, %v345_v50  ;;  %v300_v57 = vmul.f32 0.01, %v236_v47  ;;  %vm268_vm5 = vcmp.gt.f32.partialorder %v236_v47, 0.0 }
  0xa9   :  { %v299_v58 = vmul.f32 0.01, %v235_v48  ;;  %vm267_vm4 = vcmp.gt.f32.partialorder %v235_v48, 0.0  ;;  %v203_v63 = vpop.permute.xlu1 %202 }
  0xaa   :  { %v198_v0 = vpop.permute.xlu0 %197  ;;  %497 = vmax.xlane.f32.xlu1 %v2017_v51  ;;  %467 = vmax.xlane.f32.xlu0 %v2019_v54  ;;  %v252_v1 = vadd.f32 %v1904_v33, %v203_v63  ;;  %v332_v14 = vsel %vm268_vm5, %v236_v47, %v300_v57  ;;  %v1392_v47 = vunpack.c.h.bf16 %v1434_v15 }
  0xab   :  { %v251_v2 = vadd.f32 %v1904_v33, %v198_v0  ;;  %v331_v5 = vsel %vm267_vm4, %v235_v48, %v299_v58  ;;  %v2041_v26 = vadd.f32 %v1388_v9, %v332_v14 }
  0xac   :  { %v2028_v6 = vadd.f32 %v1387_v55, %v331_v5  ;;  %v316_v12 = vmul.f32 0.01, %v252_v1  ;;  %vm284_vm7 = vcmp.gt.f32.partialorder %v252_v1, 0.0  ;;  %v1424_v5 = vunpack.c.h.bf16 %v1442_v32 }
  0xad   :  { %v315_v13 = vmul.f32 0.01, %v251_v2  ;;  %vm283_vm6 = vcmp.gt.f32.partialorder %v251_v2, 0.0  ;;  %v133_v16 = vpop.permute.xlu1 %132 }
  0xae   :  { %v128_v17 = vpop.permute.xlu0 %127  ;;  %469 = vmax.xlane.f32.xlu1 %v2028_v6  ;;  %499 = vmax.xlane.f32.xlu0 %v2030_v7  ;;  %v238_v20 = vadd.f32 %v1909_v34, %v133_v16  ;;  %v348_v31 = vsel %vm284_vm7, %v252_v1, %v316_v12 }
  0xaf   :  { %v237_v21 = vadd.f32 %v1909_v34, %v128_v17  ;;  %v347_v22 = vsel %vm283_vm6, %v251_v2, %v315_v13  ;;  %v2052_v45 = vadd.f32 %v1420_v28, %v348_v31  ;;  %v1395_v2 = vunpack.c.l.bf16 %v1435_v56  ;;  %v1443_v13 = vld [vmem:[%s2467_s2 + $0x78] sm:$0xff]  }
  0xb0   :  { %v2039_v25 = vadd.f32 %v1419_v8, %v347_v22  ;;  %v302_v29 = vmul.f32 0.01, %v238_v20  ;;  %vm270_vm9 = vcmp.gt.f32.partialorder %v238_v20, 0.0  ;;  %v1427_v22 = vunpack.c.l.bf16 %v1443_v13 }
  0xb1   :  { %v301_v30 = vmul.f32 0.01, %v237_v21  ;;  %vm269_vm8 = vcmp.gt.f32.partialorder %v237_v21, 0.0  ;;  %v213_v37 = vpop.permute.xlu1 %212 }
  0xb2   :  { %v208_v40 = vpop.permute.xlu0 %207  ;;  %501 = vmax.xlane.f32.xlu1 %v2039_v25  ;;  %471 = vmax.xlane.f32.xlu0 %v2041_v26  ;;  %v254_v41 = vadd.f32 %v1904_v33, %v213_v37  ;;  %v334_v55 = vsel %vm270_vm9, %v238_v20, %v302_v29  ;;  %v1428_v37 = vunpack.c.h.bf16 %v1443_v13 }
  0xb3   :  { %v253_v42 = vadd.f32 %v1904_v33, %v208_v40  ;;  %v333_v43 = vsel %vm269_vm8, %v237_v21, %v301_v30  ;;  %v2063_v1 = vadd.f32 %v1392_v47, %v334_v55 }
  0xb4   :  { %v2050_v44 = vadd.f32 %v1391_v27, %v333_v43  ;;  %v318_v48 = vmul.f32 0.01, %v254_v41  ;;  %vm286_vm11 = vcmp.gt.f32.partialorder %v254_v41, 0.0  ;;  %v1396_v27 = vunpack.c.h.bf16 %v1435_v56 }
  0xb5   :  { %v317_v50 = vmul.f32 0.01, %v253_v42  ;;  %vm285_vm10 = vcmp.gt.f32.partialorder %v253_v42, 0.0  ;;  %v143_v57 = vpop.permute.xlu1 %142 }
  0xb6   :  { %v138_v58 = vpop.permute.xlu0 %137  ;;  %473 = vmax.xlane.f32.xlu1 %v2050_v44  ;;  %503 = vmax.xlane.f32.xlu0 %v2052_v45  ;;  %v240_v59 = vadd.f32 %v1909_v34, %v143_v57  ;;  %v350_v12 = vsel %vm286_vm11, %v254_v41, %v318_v48 }
  0xb7   :  { %v239_v60 = vadd.f32 %v1909_v34, %v138_v58  ;;  %v349_v63 = vsel %vm285_vm10, %v253_v42, %v317_v50  ;;  %v2074_v21 = vadd.f32 %v1424_v5, %v350_v12  ;;  %v1546_v42 = vld [vmem:[%s2468_s3 + $0x38] sm:$0xff]  }
  0xb8   :  { %v2061_v0 = vadd.f32 %v1423_v46, %v349_v63  ;;  %v304_v8 = vmul.f32 0.01, %v240_v59  ;;  %vm272_vm13 = vcmp.gt.f32.partialorder %v240_v59, 0.0  ;;  %1476 = vmatprep.subr.bf16.mxu0 %v1546_v42 }
  0xb9   :  { %v303_v9 = vmul.f32 0.01, %v239_v60  ;;  %vm271_vm12 = vcmp.gt.f32.partialorder %v239_v60, 0.0  ;;  %v223_v14 = vpop.permute.xlu1 %222  ;;  %1477 = vmatpush3.bf16.msra.mxu0 %v1546_v42 }
  0xba   :  { %v218_v15 = vpop.permute.xlu0 %217  ;;  %505 = vmax.xlane.f32.xlu1 %v2061_v0  ;;  %475 = vmax.xlane.f32.xlu0 %v2063_v1  ;;  %v256_v34 = vadd.f32 %v1904_v33, %v223_v14  ;;  %v336_v30 = vsel %vm272_vm13, %v240_v59, %v304_v8 }
  0xbb   :  { %v255_v16 = vadd.f32 %v1904_v33, %v218_v15  ;;  %v335_v17 = vsel %vm271_vm12, %v239_v60, %v303_v9  ;;  %v2080_v33 = vadd.f32 %v1396_v27, %v336_v30 }
  0xbc   :  { %v2072_v20 = vadd.f32 %v1395_v2, %v335_v17  ;;  %v320_v28 = vmul.f32 0.01, %v256_v34  ;;  %vm288_vm15 = vcmp.gt.f32.partialorder %v256_v34, 0.0 }
  0xbd   :  { %v319_v29 = vmul.f32 0.01, %v255_v16  ;;  %vm287_vm14 = vcmp.gt.f32.partialorder %v255_v16, 0.0 }
  0xbe   :  { %477 = vmax.xlane.f32.xlu1 %v2072_v20  ;;  %507 = vmax.xlane.f32.xlu0 %v2074_v21  ;;  %v352_v40 = vsel %vm288_vm15, %v256_v34, %v320_v28 }
  0xbf   :  { %v351_v31 = vsel %vm287_vm14, %v255_v16, %v319_v29  ;;  %v2084_v41 = vadd.f32 %v1428_v37, %v352_v40 }
  0xc0   :  { %v2078_v32 = vadd.f32 %v1427_v22, %v351_v31 }
  0xc2   :  { %509 = vmax.xlane.f32.xlu1 %v2078_v32  ;;  %479 = vmax.xlane.f32.xlu0 %v2080_v33 }
  0xc6   :  { %511 = vmax.xlane.f32.xlu0 %v2084_v41 }
 0x10f   :  { %v450_v43 = vpop.xlane.xlu0 %449 }
 0x110   :  { %v513_v46 = vsub.f32 %v1921_v49, %v450_v43 }
 0x112   :  { %v545_v47 = vmul.f32 1.442695, %v513_v46 }
 0x113   :  { %v452_v48 = vpop.xlane.xlu1 %451  ;;  %v482_v50 = vpop.xlane.xlu0 %481 }
 0x114   :  { %1562 = vpow2.f32 %v545_v47  ;;  %v514_v55 = vsub.f32 %v1929_v61, %v452_v48  ;;  %v529_v56 = vsub.f32 %v1931_v62, %v482_v50  ;;  %v1548_v50 = vld [vmem:[%s2468_s3 + $0x78] sm:$0xff]  }
 0x115   :  { %1508 = vmatprep.subr.bf16.mxu1 %v1548_v50 }
 0x116   :  { %v547_v57 = vmul.f32 1.442695, %v514_v55  ;;  %v577_v58 = vmul.f32 1.442695, %v529_v56  ;;  %1509 = vmatpush3.bf16.msra.mxu1 %v1548_v50 }
 0x117   :  { %v454_v59 = vpop.xlane.xlu1 %453  ;;  %v484_v60 = vpop.xlane.xlu0 %483 }
 0x118   :  { %1564 = vpow2.f32 %v547_v57  ;;  %v515_v63 = vsub.f32 %v1940_v10, %v454_v59  ;;  %v530_v2 = vsub.f32 %v1942_v11, %v484_v60 }
 0x119   :  { %1566 = vpow2.f32 %v577_v58 }
 0x11a   :  { %v549_v5 = vmul.f32 1.442695, %v515_v63  ;;  %v579_v49 = vmul.f32 1.442695, %v530_v2  ;;  %v1549_v2 = vld [vmem:[%s2468_s3 + $0x28] sm:$0xff]  }
 0x11b   :  { %v486_v8 = vpop.xlane.xlu1 %485  ;;  %v456_v9 = vpop.xlane.xlu0 %455 }
 0x11c   :  { %1568 = vpow2.f32 %v549_v5  ;;  %v531_v12 = vsub.f32 %v1951_v23, %v486_v8  ;;  %v516_v61 = vsub.f32 %v1953_v24, %v456_v9  ;;  %v1550_v5 = vld [vmem:[%s2468_s3 + $0x70] sm:$0xff]  }
 0x11d   :  { %1570 = vpow2.f32 %v579_v49  ;;  %1510 = vmatprep.subr.bf16.mxu1 %v1550_v5 }
 0x11e   :  { %v581_v62 = vmul.f32 1.442695, %v531_v12  ;;  %v551_v13 = vmul.f32 1.442695, %v516_v61  ;;  %1511 = vmatpush3.bf16.msra.mxu1 %v1550_v5 }
 0x11f   :  { %v458_v14 = vpop.xlane.xlu1 %457  ;;  %v488_v15 = vpop.xlane.xlu0 %487 }
 0x120   :  { %1572 = vpow2.f32 %v581_v62  ;;  %v517_v10 = vsub.f32 %v1962_v38, %v458_v14  ;;  %v532_v11 = vsub.f32 %v1964_v39, %v488_v15 }
 0x121   :  { %v2099_v34 = vpop.eup %1562  ;;  %1574 = vpow2.f32 %v551_v13 }
 0x122   :  { %v553_v16 = vmul.f32 1.442695, %v517_v10  ;;  %v583_v17 = vmul.f32 1.442695, %v532_v11  ;;  %609 = vadd.xlane.f32.xlu1 %v2099_v34  ;;  %v1551_v10 = vld [vmem:[%s2468_s3 + $0x20] sm:$0xff]  }
 0x123   :  { %v490_v23 = vpop.xlane.xlu1 %489  ;;  %v460_v22 = vpop.xlane.xlu0 %459 }
 0x124   :  { %1576 = vpow2.f32 %v553_v16  ;;  %v533_v24 = vsub.f32 %v1973_v52, %v490_v23  ;;  %v518_v27 = vsub.f32 %v1975_v53, %v460_v22 }
 0x125   :  { %v2104_v28 = vpop.eup %1564  ;;  %1578 = vpow2.f32 %v583_v17 }
 0x126   :  { %v2106_v38 = vpop.eup %1566  ;;  %v585_v39 = vmul.f32 1.442695, %v533_v24  ;;  %v555_v29 = vmul.f32 1.442695, %v518_v27  ;;  %611 = vadd.xlane.f32.xlu0 %v2104_v28 }
 0x127   :  { %641 = vadd.xlane.f32.xlu1 %v2106_v38  ;;  %v462_v30 = vpop.xlane.xlu1 %461  ;;  %v492_v31 = vpop.xlane.xlu0 %491 }
 0x128   :  { %1580 = vpow2.f32 %v585_v39  ;;  %v519_v37 = vsub.f32 %v1984_v3, %v462_v30  ;;  %v534_v52 = vsub.f32 %v1986_v4, %v492_v31  ;;  %v1547_v4 = vld [vmem:[%s2468_s3 + $0x30] sm:$0xff]   ;;  %v1553_v39 = vld [vmem:[%s2468_s3 + $0x18] sm:$0xff]  }
 0x129   :  { %v2112_v40 = vpop.eup %1568  ;;  %1582 = vpow2.f32 %v555_v29  ;;  %1478 = vmatprep.subr.bf16.mxu0 %v1547_v4 }
 0x12a   :  { %v2114_v53 = vpop.eup %1570  ;;  %v557_v42 = vmul.f32 1.442695, %v519_v37  ;;  %v587_v43 = vmul.f32 1.442695, %v534_v52  ;;  %1479 = vmatpush3.bf16.msra.mxu0 %v1547_v4 }
 0x12b   :  { %613 = vadd.xlane.f32.xlu1 %v2112_v40  ;;  %643 = vadd.xlane.f32.xlu0 %v2114_v53  ;;  %v494_v46 = vpop.xlane.xlu1 %493  ;;  %v464_v47 = vpop.xlane.xlu0 %463 }
 0x12c   :  { %1584 = vpow2.f32 %v557_v42  ;;  %v535_v48 = vsub.f32 %v1995_v18, %v494_v46  ;;  %v520_v3 = vsub.f32 %v1997_v19, %v464_v47  ;;  %1480 = vmatprep.subr.bf16.mxu0 %v1549_v2  ;;  %v1555_v46 = vld [vmem:[%s2468_s3 + $0x10] sm:$0xff]  }
 0x12d   :  { %v2126_v55 = vpop.eup %1572  ;;  %1586 = vpow2.f32 %v587_v43 }
 0x12e   :  { %v2128_v56 = vpop.eup %1574  ;;  %v589_v57 = vmul.f32 1.442695, %v535_v48  ;;  %v559_v58 = vmul.f32 1.442695, %v520_v3  ;;  %1481 = vmatpush3.bf16.msra.mxu0 %v1549_v2 }
 0x12f   :  { %645 = vadd.xlane.f32.xlu1 %v2126_v55  ;;  %615 = vadd.xlane.f32.xlu0 %v2128_v56  ;;  %v466_v18 = vpop.xlane.xlu1 %465  ;;  %v496_v19 = vpop.xlane.xlu0 %495 }
 0x130   :  { %1588 = vpow2.f32 %v589_v57  ;;  %v521_v59 = vsub.f32 %v2006_v35, %v466_v18  ;;  %v536_v60 = vsub.f32 %v2008_v36, %v496_v19  ;;  %1482 = vmatprep.subr.bf16.mxu0 %v1551_v10  ;;  %v1557_v18 = vld [vmem:[%s2468_s3 + $0x8] sm:$0xff]  }
 0x131   :  { %v2134_v63 = vpop.eup %1576  ;;  %1590 = vpow2.f32 %v559_v58 }
 0x132   :  { %v2142_v49 = vpop.eup %1578  ;;  %v561_v8 = vmul.f32 1.442695, %v521_v59  ;;  %v591_v9 = vmul.f32 1.442695, %v536_v60  ;;  %1483 = vmatpush3.bf16.msra.mxu0 %v1551_v10 }
 0x133   :  { %617 = vadd.xlane.f32.xlu1 %v2134_v63  ;;  %647 = vadd.xlane.f32.xlu0 %v2142_v49  ;;  %v498_v35 = vpop.xlane.xlu1 %497  ;;  %v468_v36 = vpop.xlane.xlu0 %467 }
 0x134   :  { %1592 = vpow2.f32 %v561_v8  ;;  %v537_v12 = vsub.f32 %v2017_v51, %v498_v35  ;;  %v522_v61 = vsub.f32 %v2019_v54, %v468_v36  ;;  %v1552_v51 = vld [vmem:[%s2468_s3 + $0x68] sm:$0xff]   ;;  %1484 = vmatprep.subr.bf16.mxu0 %v1553_v39  ;;  %v1559_v35 = vld [vmem:[%s2468_s3] sm:$0xff]  }
 0x135   :  { %v2148_v62 = vpop.eup %1580  ;;  %1594 = vpow2.f32 %v591_v9  ;;  %1512 = vmatprep.subr.bf16.mxu1 %v1552_v51 }
 0x136   :  { %v2150_v13 = vpop.eup %1582  ;;  %v593_v14 = vmul.f32 1.442695, %v537_v12  ;;  %v563_v15 = vmul.f32 1.442695, %v522_v61  ;;  %1513 = vmatpush3.bf16.msra.mxu1 %v1552_v51  ;;  %1485 = vmatpush3.bf16.msra.mxu0 %v1553_v39 }
 0x137   :  { %649 = vadd.xlane.f32.xlu1 %v2148_v62  ;;  %619 = vadd.xlane.f32.xlu0 %v2150_v13  ;;  %v470_v54 = vpop.xlane.xlu1 %469  ;;  %v500_v11 = vpop.xlane.xlu0 %499 }
 0x138   :  { %1596 = vpow2.f32 %v593_v14  ;;  %v523_v16 = vsub.f32 %v2028_v6, %v470_v54  ;;  %v538_v17 = vsub.f32 %v2030_v7, %v500_v11  ;;  %v1554_v6 = vld [vmem:[%s2468_s3 + $0x60] sm:$0xff]   ;;  %1486 = vmatprep.subr.bf16.mxu0 %v1555_v46 }
 0x139   :  { %v2162_v23 = vpop.eup %1584  ;;  %1598 = vpow2.f32 %v563_v15  ;;  %1514 = vmatprep.subr.bf16.mxu1 %v1554_v6  ;;  %v1561_v54 = vld [vmem:[%s2468_s3 + $0x40] sm:$0xff]  }
 0x13a   :  { %v2164_v22 = vpop.eup %1586  ;;  %v565_v24 = vmul.f32 1.442695, %v523_v16  ;;  %v595_v27 = vmul.f32 1.442695, %v538_v17  ;;  %1515 = vmatpush3.bf16.msra.mxu1 %v1554_v6  ;;  %1487 = vmatpush3.bf16.msra.mxu0 %v1555_v46 }
 0x13b   :  { %621 = vadd.xlane.f32.xlu1 %v2162_v23  ;;  %651 = vadd.xlane.f32.xlu0 %v2164_v22  ;;  %v502_v7 = vpop.xlane.xlu1 %501  ;;  %v472_v29 = vpop.xlane.xlu0 %471 }
 0x13c   :  { %1600 = vpow2.f32 %v565_v24  ;;  %v539_v30 = vsub.f32 %v2039_v25, %v502_v7  ;;  %v524_v31 = vsub.f32 %v2041_v26, %v472_v29  ;;  %v1556_v25 = vld [vmem:[%s2468_s3 + $0x58] sm:$0xff]   ;;  %1488 = vmatprep.subr.bf16.mxu0 %v1557_v18 }
 0x13d   :  { %v2176_v37 = vpop.eup %1588  ;;  %1602 = vpow2.f32 %v595_v27  ;;  %1516 = vmatprep.subr.bf16.mxu1 %v1556_v25 }
 0x13e   :  { %v2178_v52 = vpop.eup %1590  ;;  %v597_v42 = vmul.f32 1.442695, %v539_v30  ;;  %v567_v43 = vmul.f32 1.442695, %v524_v31  ;;  %1517 = vmatpush3.bf16.msra.mxu1 %v1556_v25  ;;  %1489 = vmatpush3.bf16.msra.mxu0 %v1557_v18 }
 0x13f   :  { %653 = vadd.xlane.f32.xlu1 %v2176_v37  ;;  %623 = vadd.xlane.f32.xlu0 %v2178_v52  ;;  %v474_v26 = vpop.xlane.xlu1 %473  ;;  %v504_v47 = vpop.xlane.xlu0 %503 }
 0x140   :  { %1604 = vpow2.f32 %v597_v42  ;;  %v525_v48 = vsub.f32 %v2050_v44, %v474_v26  ;;  %v540_v3 = vsub.f32 %v2052_v45, %v504_v47  ;;  %v1558_v44 = vld [vmem:[%s2468_s3 + $0x50] sm:$0xff]   ;;  %1490 = vmatprep.subr.bf16.mxu0 %v1559_v35 }
 0x141   :  { %v2190_v4 = vpop.eup %1592  ;;  %1606 = vpow2.f32 %v567_v43  ;;  %1518 = vmatprep.subr.bf16.mxu1 %v1558_v44 }
 0x142   :  { %v2192_v50 = vpop.eup %1594  ;;  %v569_v57 = vmul.f32 1.442695, %v525_v48  ;;  %v599_v58 = vmul.f32 1.442695, %v540_v3  ;;  %1519 = vmatpush3.bf16.msra.mxu1 %v1558_v44  ;;  %1491 = vmatpush3.bf16.msra.mxu0 %v1559_v35 }
 0x143   :  { %625 = vadd.xlane.f32.xlu1 %v2190_v4  ;;  %655 = vadd.xlane.f32.xlu0 %v2192_v50  ;;  %v506_v45 = vpop.xlane.xlu1 %505  ;;  %v476_v19 = vpop.xlane.xlu0 %475 }
 0x144   :  { %1608 = vpow2.f32 %v569_v57  ;;  %v541_v59 = vsub.f32 %v2061_v0, %v506_v45  ;;  %v526_v60 = vsub.f32 %v2063_v1, %v476_v19  ;;  %v1560_v0 = vld [vmem:[%s2468_s3 + $0x48] sm:$0xff]   ;;  %s1777_s3 = smov [#allocation2]  }
 0x145   :  { %v2204_v2 = vpop.eup %1596  ;;  %1610 = vpow2.f32 %v599_v58  ;;  %1520 = vmatprep.subr.bf16.mxu1 %v1560_v0  ;;  %s1304_s9 = sshll.u32 %s1777_s3, 4  ;;  %s1305_s9 = int_to_ptr.vmem [resolvable:$true] %s1304_s9 }
 0x146   :  { %v2206_v5 = vpop.eup %1598  ;;  %v601_v8 = vmul.f32 1.442695, %v541_v59  ;;  %v571_v9 = vmul.f32 1.442695, %v526_v60  ;;  %1521 = vmatpush3.bf16.msra.mxu1 %v1560_v0  ;;  %s1754_s10 = scalar_lea.vmem %s1305_s9, 4096  ;;  %p1759_p1 = scmp.lt.s32.totalorder %s1305_s9, %s1305_s9 }
 0x147   :  { %657 = vadd.xlane.f32.xlu1 %v2204_v2  ;;  %627 = vadd.xlane.f32.xlu0 %v2206_v5  ;;  %v478_v1 = vpop.xlane.xlu1 %477  ;;  %v508_v36 = vpop.xlane.xlu0 %507  ;;  %p1755_p0 = scmp.ne.s32.totalorder %s1305_s9, %s1754_s10  ;;  %p1760_p2 = scmp.lt.s32.totalorder %s1754_s10, %s1754_s10 }
 0x148   :  { %1612 = vpow2.f32 %v601_v8  ;;  %v527_v12 = vsub.f32 %v2072_v20, %v478_v1  ;;  %v542_v61 = vsub.f32 %v2074_v21, %v508_v36  ;;  %1522 = vmatprep.subr.bf16.mxu1 %v1561_v54 }
 0x149   :  { %v2218_v14 = vpop.eup %1600  ;;  %1614 = vpow2.f32 %v571_v9  ;;  %p1761_p3 = por %p1760_p2, %p1759_p1 }
 0x14a   :  { %v2220_v15 = vpop.eup %1602  ;;  %v573_v10 = vmul.f32 1.442695, %v527_v12  ;;  %v603_v51 = vmul.f32 1.442695, %v542_v61  ;;  %1523 = vmatpush3.bf16.msra.mxu1 %v1561_v54 }
 0x14b   :  { %629 = vadd.xlane.f32.xlu1 %v2218_v14  ;;  %659 = vadd.xlane.f32.xlu0 %v2220_v15  ;;  %v510_v20 = vpop.xlane.xlu1 %509  ;;  %v480_v21 = vpop.xlane.xlu0 %479  ;;  %p1762_p4 = pnand %p1761_p3, %p1755_p0 }
 0x14c   :  { %1616 = vpow2.f32 %v573_v10  ;;  %v543_v11 = vsub.f32 %v2078_v32, %v510_v20  ;;  %v528_v16 = vsub.f32 %v2080_v33, %v480_v21 }
 0x14d   :  { %v2229_v17 = vpop.eup %1604  ;;  %1618 = vpow2.f32 %v603_v51 }
 0x14e   :  { %v2231_v24 = vpop.eup %1606  ;;  %v605_v27 = vmul.f32 1.442695, %v543_v11  ;;  %v575_v39 = vmul.f32 1.442695, %v528_v16 }
 0x14f   :  { %661 = vadd.xlane.f32.xlu1 %v2229_v17  ;;  %631 = vadd.xlane.f32.xlu0 %v2231_v24  ;;  %v512_v6 = vpop.xlane.xlu0 %511 }
 0x150   :  { %1620 = vpow2.f32 %v605_v27  ;;  %v544_v7 = vsub.f32 %v2084_v41, %v512_v6 }
 0x151   :  { %v2236_v32 = vpop.eup %1608  ;;  %1622 = vpow2.f32 %v575_v39 }
 0x152   :  { %v2238_v33 = vpop.eup %1610  ;;  %v607_v29 = vmul.f32 1.442695, %v544_v7 }
 0x153   :  { %633 = vadd.xlane.f32.xlu1 %v2236_v32  ;;  %663 = vadd.xlane.f32.xlu0 %v2238_v33 }
 0x154   :  { %1624 = vpow2.f32 %v607_v29 }
 0x155   :  { %v2242_v30 = vpop.eup %1612 }
 0x156   :  { %v2244_v31 = vpop.eup %1614 }
 0x157   :  { %665 = vadd.xlane.f32.xlu1 %v2242_v30  ;;  %635 = vadd.xlane.f32.xlu0 %v2244_v31 }
 0x159   :  { %v2248_v41 = vpop.eup %1616 }
 0x15a   :  { %v2250_v42 = vpop.eup %1618 }
 0x15b   :  { %637 = vadd.xlane.f32.xlu1 %v2248_v41  ;;  %667 = vadd.xlane.f32.xlu0 %v2250_v42 }
 0x15d   :  { %v2254_v43 = vpop.eup %1620 }
 0x15e   :  { %v2256_v46 = vpop.eup %1622 }
 0x15f   :  { %669 = vadd.xlane.f32.xlu1 %v2254_v43  ;;  %639 = vadd.xlane.f32.xlu0 %v2256_v46 }
 0x161   :  { %v2260_v25 = vpop.eup %1624 }
 0x163   :  { %671 = vadd.xlane.f32.xlu0 %v2260_v25 }
 0x1ab   :  { %v610_v26 = vpop.xlane.xlu1 %609 }
 0x1ac   :  { %1626 = vrcp.f32 %v610_v26 }
 0x1af   :  { %v612_v47 = vpop.xlane.xlu0 %611 }
 0x1b0   :  { %v642_v48 = vpop.xlane.xlu1 %641  ;;  %1628 = vrcp.f32 %v612_v47 }
 0x1b1   :  { %1630 = vrcp.f32 %v642_v48 }
 0x1b4   :  { %v614_v3 = vpop.xlane.xlu1 %613  ;;  %v644_v57 = vpop.xlane.xlu0 %643 }
 0x1b5   :  { %1632 = vrcp.f32 %v644_v57 }
 0x1b6   :  { %1634 = vrcp.f32 %v614_v3 }
 0x1b8   :  { %v646_v58 = vpop.xlane.xlu1 %645  ;;  %v616_v18 = vpop.xlane.xlu0 %615 }
 0x1b9   :  { %1636 = vrcp.f32 %v616_v18  ;;  %v1627_v44 = vpop.eup %1626 }
 0x1ba   :  { %1638 = vrcp.f32 %v646_v58  ;;  %v705_v60 = vmul.f32 %v1627_v44, %v2099_v34 }
 0x1bc   :  { %v618_v45 = vpop.xlane.xlu1 %617  ;;  %v648_v19 = vpop.xlane.xlu0 %647 }
 0x1bd   :  { %v1629_v59 = vpop.eup %1628  ;;  %1640 = vrcp.f32 %v648_v19 }
 0x1be   :  { %v706_v8 = vmul.f32 %v1629_v59, %v2104_v28  ;;  %1642 = vrcp.f32 %v618_v45  ;;  %v1631_v1 = vpop.eup %1630 }
 0x1bf   :  { %v721_v10 = vmul.f32 %v1631_v1, %v2106_v38 }
 0x1c0   :  { %v650_v9 = vpop.xlane.xlu1 %649  ;;  %v620_v35 = vpop.xlane.xlu0 %619  ;;  %v737_v0 = vpack.c.bf16 %v706_v8, %v705_v60 }
 0x1c1   :  { %1644 = vrcp.f32 %v620_v35 }
 0x1c2   :  { %1492 = vmatprep.mubr.bf16.mxu0 %v737_v0  ;;  %v1633_v36 = vpop.eup %1632  ;;  %1646 = vrcp.f32 %v650_v9 }
 0x1c3   :  { %v722_v51 = vmul.f32 %v1633_v36, %v2114_v53  ;;  %v1635_v54 = vpop.eup %1634 }
 0x1c4   :  { %v622_v12 = vpop.xlane.xlu1 %621  ;;  %v652_v61 = vpop.xlane.xlu0 %651  ;;  %v707_v11 = vmul.f32 %v1635_v54, %v2112_v40 }
 0x1c5   :  { %1648 = vrcp.f32 %v652_v61  ;;  %v745_v34 = vpack.c.bf16 %v722_v51, %v721_v10 }
 0x1c6   :  { %v1637_v20 = vpop.eup %1636  ;;  %1650 = vrcp.f32 %v622_v12 }
 0x1c7   :  { %1524 = vmatprep.mubr.bf16.mxu1 %v745_v34  ;;  %v708_v16 = vmul.f32 %v1637_v20, %v2128_v56  ;;  %v1639_v27 = vpop.eup %1638 }
 0x1c8   :  { %v654_v28 = vpop.xlane.xlu1 %653  ;;  %v624_v21 = vpop.xlane.xlu0 %623  ;;  %v723_v7 = vmul.f32 %v1639_v27, %v2126_v55 }
 0x1c9   :  { %1652 = vrcp.f32 %v624_v21  ;;  %v738_v39 = vpack.c.bf16 %v708_v16, %v707_v11 }
 0x1ca   :  { %v1641_v6 = vpop.eup %1640  ;;  %1654 = vrcp.f32 %v654_v28 }
 0x1cb   :  { %1493 = vmatmul.mubr.bf16.vlgmr.msra.gmra.mxu0 %v738_v39  ;;  %v724_v29 = vmul.f32 %v1641_v6, %v2142_v49  ;;  %v1643_v26 = vpop.eup %1642 }
 0x1cc   :  { %v626_v38 = vpop.xlane.xlu1 %625  ;;  %v656_v53 = vpop.xlane.xlu0 %655  ;;  %v709_v3 = vmul.f32 %v1643_v26, %v2134_v63 }
 0x1cd   :  { %1656 = vrcp.f32 %v656_v53  ;;  %v746_v47 = vpack.c.bf16 %v724_v29, %v723_v7 }
 0x1ce   :  { %v1645_v48 = vpop.eup %1644  ;;  %1658 = vrcp.f32 %v626_v38 }
 0x1cf   :  { %1525 = vmatmul.mubr.bf16.vlgmr.msra.gmra.mxu1 %v746_v47  ;;  %v710_v57 = vmul.f32 %v1645_v48, %v2150_v13  ;;  %v1647_v58 = vpop.eup %1646 }
 0x1d0   :  { %v658_v40 = vpop.xlane.xlu1 %657  ;;  %v628_v56 = vpop.xlane.xlu0 %627  ;;  %v725_v45 = vmul.f32 %v1647_v58, %v2148_v62 }
 0x1d1   :  { %1660 = vrcp.f32 %v628_v56  ;;  %v739_v18 = vpack.c.bf16 %v710_v57, %v709_v3 }
 0x1d2   :  { %v1649_v44 = vpop.eup %1648  ;;  %1662 = vrcp.f32 %v658_v40 }
 0x1d3   :  { %1496 = vmatprep.mubr.bf16.mxu0 %v739_v18  ;;  %v726_v19 = vmul.f32 %v1649_v44, %v2164_v22  ;;  %v1651_v59 = vpop.eup %1650 }
 0x1d4   :  { %v630_v55 = vpop.xlane.xlu1 %629  ;;  %v660_v49 = vpop.xlane.xlu0 %659  ;;  %v711_v9 = vmul.f32 %v1651_v59, %v2162_v23 }
 0x1d5   :  { %1664 = vrcp.f32 %v660_v49  ;;  %v747_v60 = vpack.c.bf16 %v726_v19, %v725_v45 }
 0x1d6   :  { %v1653_v8 = vpop.eup %1652  ;;  %1666 = vrcp.f32 %v630_v55 }
 0x1d7   :  { %1528 = vmatprep.mubr.bf16.mxu1 %v747_v60  ;;  %v712_v35 = vmul.f32 %v1653_v8, %v2178_v52  ;;  %v1655_v0 = vpop.eup %1654 }
 0x1d8   :  { %v662_v63 = vpop.xlane.xlu1 %661  ;;  %v632_v13 = vpop.xlane.xlu0 %631  ;;  %v727_v12 = vmul.f32 %v1655_v0, %v2176_v37 }
 0x1d9   :  { %1668 = vrcp.f32 %v632_v13  ;;  %v740_v1 = vpack.c.bf16 %v712_v35, %v711_v9 }
 0x1da   :  { %v1657_v36 = vpop.eup %1656  ;;  %1670 = vrcp.f32 %v662_v63 }
 0x1db   :  { %1497 = vmatmul.mubr.bf16.gmra.mxu0 %v740_v1  ;;  %v728_v61 = vmul.f32 %v1657_v36, %v2192_v50  ;;  %v1659_v10 = vpop.eup %1658 }
 0x1dc   :  { %v634_v62 = vpop.xlane.xlu1 %633  ;;  %v664_v22 = vpop.xlane.xlu0 %663  ;;  %v713_v34 = vmul.f32 %v1659_v10, %v2190_v4 }
 0x1dd   :  { %1672 = vrcp.f32 %v664_v22  ;;  %v748_v51 = vpack.c.bf16 %v728_v61, %v727_v12 }
 0x1de   :  { %v1661_v54 = vpop.eup %1660  ;;  %1674 = vrcp.f32 %v634_v62 }
 0x1df   :  { %1529 = vmatmul.mubr.bf16.gmra.mxu1 %v748_v51  ;;  %v714_v20 = vmul.f32 %v1661_v54, %v2206_v5  ;;  %v1663_v28 = vpop.eup %1662 }
 0x1e0   :  { %v666_v23 = vpop.xlane.xlu1 %665  ;;  %v636_v52 = vpop.xlane.xlu0 %635  ;;  %v729_v16 = vmul.f32 %v1663_v28, %v2204_v2 }
 0x1e1   :  { %1676 = vrcp.f32 %v636_v52  ;;  %v741_v21 = vpack.c.bf16 %v714_v20, %v713_v34 }
 0x1e2   :  { %v1665_v11 = vpop.eup %1664  ;;  %1678 = vrcp.f32 %v666_v23 }
 0x1e3   :  { %1500 = vmatprep.mubr.bf16.mxu0 %v741_v21  ;;  %v730_v27 = vmul.f32 %v1665_v11, %v2220_v15  ;;  %v1667_v39 = vpop.eup %1666 }
 0x1e4   :  { %v638_v37 = vpop.xlane.xlu1 %637  ;;  %v668_v50 = vpop.xlane.xlu0 %667  ;;  %v715_v53 = vmul.f32 %v1667_v39, %v2218_v14 }
 0x1e5   :  { %1680 = vrcp.f32 %v668_v50  ;;  %v749_v6 = vpack.c.bf16 %v730_v27, %v729_v16 }
 0x1e6   :  { %v1669_v38 = vpop.eup %1668  ;;  %1682 = vrcp.f32 %v638_v37 }
 0x1e7   :  { %1532 = vmatprep.mubr.bf16.mxu1 %v749_v6  ;;  %v716_v7 = vmul.f32 %v1669_v38, %v2231_v24  ;;  %v1671_v29 = vpop.eup %1670 }
 0x1e8   :  { %v670_v4 = vpop.xlane.xlu1 %669  ;;  %v640_v5 = vpop.xlane.xlu0 %639  ;;  %v731_v15 = vmul.f32 %v1671_v29, %v2229_v17 }
 0x1e9   :  { %1684 = vrcp.f32 %v640_v5  ;;  %v742_v26 = vpack.c.bf16 %v716_v7, %v715_v53 }
 0x1ea   :  { %v1673_v47 = vpop.eup %1672  ;;  %1686 = vrcp.f32 %v670_v4 }
 0x1eb   :  { %1501 = vmatmul.mubr.bf16.gmra.mxu0 %v742_v26  ;;  %v732_v48 = vmul.f32 %v1673_v47, %v2238_v33  ;;  %v1675_v40 = vpop.eup %1674 }
 0x1ec   :  { %v672_v2 = vpop.xlane.xlu0 %671  ;;  %v717_v14 = vmul.f32 %v1675_v40, %v2236_v32 }
 0x1ed   :  { %1688 = vrcp.f32 %v672_v2  ;;  %v750_v56 = vpack.c.bf16 %v732_v48, %v731_v15 }
 0x1ee   :  { %v1677_v3 = vpop.eup %1676 }
 0x1ef   :  { %1533 = vmatmul.mubr.bf16.gmra.mxu1 %v750_v56  ;;  %v718_v24 = vmul.f32 %v1677_v3, %v2244_v31  ;;  %v1679_v57 = vpop.eup %1678 }
 0x1f0   :  { %v733_v44 = vmul.f32 %v1679_v57, %v2242_v30 }
 0x1f1   :  { %v743_v58 = vpack.c.bf16 %v718_v24, %v717_v14 }
 0x1f2   :  { %v1681_v18 = vpop.eup %1680 }
 0x1f3   :  { %1504 = vmatprep.mubr.bf16.mxu0 %v743_v58  ;;  %v734_v55 = vmul.f32 %v1681_v18, %v2250_v42  ;;  %v1683_v17 = vpop.eup %1682 }
 0x1f4   :  { %v719_v19 = vmul.f32 %v1683_v17, %v2248_v41 }
 0x1f5   :  { %v751_v49 = vpack.c.bf16 %v734_v55, %v733_v44 }
 0x1f6   :  { %v1685_v33 = vpop.eup %1684 }
 0x1f7   :  { %v1687_v45 = vpop.eup %1686  ;;  %1536 = vmatprep.mubr.bf16.mxu1 %v751_v49  ;;  %v720_v59 = vmul.f32 %v1685_v33, %v2256_v46 }
 0x1f8   :  { %v735_v31 = vmul.f32 %v1687_v45, %v2254_v43 }
 0x1f9   :  { %v744_v60 = vpack.c.bf16 %v720_v59, %v719_v19 }
 0x1fa   :  { %v1689_v32 = vpop.eup %1688 }
 0x1fb   :  { %v736_v8 = vmul.f32 %v1689_v32, %v2260_v25  ;;  %1505 = vmatmul.mubr.bf16.gmra.mxu0 %v744_v60 }
 0x1fd   :  { %v752_v63 = vpack.c.bf16 %v736_v8, %v735_v31 }
 0x1ff   :  { %1537 = vmatmul.mubr.bf16.gmra.mxu1 %v752_v63 }
 0x28b   :  { %v1494_v30 = vpop.f32.mrf.mxu0 }
 0x28c   :  { %v1077_v42 = vmin.f32 %v1494_v30, 0.0  ;;  %vm1205_vm0 = vcmp.gt.f32.partialorder %v1494_v30, 0.0 }
 0x28d   :  { %v867_v13 = vpop.f32.mrf.mxu0 }
 0x28e   :  { %v1111_v9 = vmul.f32 1.442695, %v1077_v42  ;;  %v1075_v35 = vmin.f32 %v867_v13, 0.0  ;;  %vm1203_vm1 = vcmp.gt.f32.partialorder %v867_v13, 0.0 }
 0x28f   :  { %v2295_v0 = vpop.f32.mrf.mxu0  ;;  %v2297_v1 = vpop.f32.mrf.mxu1 }
 0x290   :  { %1690 = vpow2.f32 %v1111_v9  ;;  %v1107_v41 = vmul.f32 1.442695, %v1075_v35  ;;  %v1078_v46 = vmin.f32 %v2295_v0, 0.0  ;;  %v1093_v43 = vmin.f32 %v2297_v1, 0.0 }
 0x291   :  { %v2301_v36 = vpop.f32.mrf.mxu0  ;;  %v2303_v25 = vpop.f32.mrf.mxu1  ;;  %vm1206_vm2 = vcmp.gt.f32.partialorder %v2295_v0, 0.0  ;;  %vm1221_vm3 = vcmp.gt.f32.partialorder %v2297_v1, 0.0 }
 0x292   :  { %1692 = vpow2.f32 %v1107_v41  ;;  %v1113_v62 = vmul.f32 1.442695, %v1078_v46  ;;  %v1076_v22 = vmin.f32 %v2301_v36, 0.0  ;;  %v1143_v12 = vmul.f32 1.442695, %v1093_v43 }
 0x293   :  { %v1091_v61 = vmin.f32 %v2303_v25, 0.0  ;;  %v2307_v10 = vpop.f32.mrf.mxu1  ;;  %vm1204_vm4 = vcmp.gt.f32.partialorder %v2301_v36, 0.0  ;;  %vm1219_vm5 = vcmp.gt.f32.partialorder %v2303_v25, 0.0 }
 0x294   :  { %1694 = vpow2.f32 %v1113_v62  ;;  %v1109_v51 = vmul.f32 1.442695, %v1076_v22  ;;  %v1094_v54 = vmin.f32 %v2307_v10, 0.0  ;;  %vm1222_vm6 = vcmp.gt.f32.partialorder %v2307_v10, 0.0 }
 0x295   :  { %1696 = vpow2.f32 %v1143_v12  ;;  %v1139_v23 = vmul.f32 1.442695, %v1091_v61  ;;  %v2310_v52 = vpop.f32.mrf.mxu1 }
 0x296   :  { %1698 = vpow2.f32 %v1109_v51  ;;  %v1145_v34 = vmul.f32 1.442695, %v1094_v54  ;;  %v1092_v20 = vmin.f32 %v2310_v52, 0.0  ;;  %vm1220_vm7 = vcmp.gt.f32.partialorder %v2310_v52, 0.0 }
 0x297   :  { %1700 = vpow2.f32 %v1139_v23 }
 0x298   :  { %1702 = vpow2.f32 %v1145_v34  ;;  %v1141_v28 = vmul.f32 1.442695, %v1092_v20 }
 0x29a   :  { %1704 = vpow2.f32 %v1141_v28 }
 0x29b   :  { %v2313_v21 = vpop.f32.mrf.mxu0 }
 0x29c   :  { %v1081_v11 = vmin.f32 %v2313_v21, 0.0  ;;  %vm1209_vm8 = vcmp.gt.f32.partialorder %v2313_v21, 0.0 }
 0x29d   :  { %v1691_v37 = vpop.eup %1690  ;;  %v2316_v50 = vpop.f32.mrf.mxu0 }
 0x29e   :  { %v1335_v16 = vadd.f32 -1.0, %v1691_v37  ;;  %v1119_v27 = vmul.f32 1.442695, %v1081_v11  ;;  %v1079_v39 = vmin.f32 %v2316_v50, 0.0  ;;  %vm1207_vm9 = vcmp.gt.f32.partialorder %v2316_v50, 0.0 }
 0x29f   :  { %v1693_v6 = vpop.eup %1692  ;;  %v2319_v38 = vpop.f32.mrf.mxu0 }
 0x2a0   :  { %v2321_v4 = vpop.f32.mrf.mxu1  ;;  %v1237_v5 = vsel %vm1205_vm0, %v1494_v30, %v1335_v16  ;;  %v1333_v53 = vadd.f32 -1.0, %v1693_v6  ;;  %1706 = vpow2.f32 %v1119_v27  ;;  %v1115_v7 = vmul.f32 1.442695, %v1079_v39 }
 0x2a1   :  { %v1695_v29 = vpop.eup %1694  ;;  %1269 = vst [vmem:[#allocation2 + $0x10] sm:$0xff] %v1237_v5  ;;  %v1082_v26 = vmin.f32 %v2319_v38, 0.0  ;;  %v1097_v47 = vmin.f32 %v2321_v4, 0.0  ;;  %v2327_v2 = vpop.f32.mrf.mxu0  ;;  %vm1210_vm10 = vcmp.gt.f32.partialorder %v2319_v38, 0.0  ;;  %vm1225_vm11 = vcmp.gt.f32.partialorder %v2321_v4, 0.0 }
 0x2a2   :  { %v2329_v15 = vpop.f32.mrf.mxu1  ;;  %v1697_v48 = vpop.eup %1696  ;;  %v1235_v40 = vsel %vm1203_vm1, %v867_v13, %v1333_v53  ;;  %v1336_v56 = vadd.f32 -1.0, %v1695_v29  ;;  %1708 = vpow2.f32 %v1115_v7  ;;  %v1080_v3 = vmin.f32 %v2327_v2, 0.0 }
 0x2a3   :  { %v1699_v14 = vpop.eup %1698  ;;  %1267 = vst [vmem:[#allocation2] sm:$0xff] %v1235_v40  ;;  %v1351_v24 = vadd.f32 -1.0, %v1697_v48  ;;  %v1121_v57 = vmul.f32 1.442695, %v1082_v26  ;;  %v1151_v58 = vmul.f32 1.442695, %v1097_v47 }
 0x2a4   :  { %v2334_v18 = vpop.f32.mrf.mxu1  ;;  %v1701_v44 = vpop.eup %1700  ;;  %v1238_v55 = vsel %vm1206_vm2, %v2295_v0, %v1336_v56  ;;  %v1334_v17 = vadd.f32 -1.0, %v1699_v14  ;;  %v1117_v49 = vmul.f32 1.442695, %v1080_v3  ;;  %v1095_v33 = vmin.f32 %v2329_v15, 0.0 }
 0x2a5   :  { %v1703_v45 = vpop.eup %1702  ;;  %1270 = vst [vmem:[#allocation2 + $0x18] sm:$0xff] %v1238_v55  ;;  %v1253_v19 = vsel %vm1221_vm3, %v2297_v1, %v1351_v24  ;;  %v1349_v59 = vadd.f32 -1.0, %v1701_v44  ;;  %1710 = vpow2.f32 %v1121_v57  ;;  %v1098_v42 = vmin.f32 %v2334_v18, 0.0 }
 0x2a6   :  { %v2344_v32 = vpop.f32.mrf.mxu1  ;;  %1285 = vst [vmem:[#allocation2 + $0x90] sm:$0xff] %v1253_v19  ;;  %v1236_v60 = vsel %vm1204_vm4, %v2301_v36, %v1334_v17  ;;  %v1352_v31 = vadd.f32 -1.0, %v1703_v45  ;;  %1712 = vpow2.f32 %v1151_v58  ;;  %v1147_v8 = vmul.f32 1.442695, %v1095_v33 }
 0x2a7   :  { %v1705_v63 = vpop.eup %1704  ;;  %1268 = vst [vmem:[#allocation2 + $0x8] sm:$0xff] %v1236_v60  ;;  %v1251_v30 = vsel %vm1219_vm5, %v2303_v25, %v1349_v59  ;;  %1714 = vpow2.f32 %v1117_v49  ;;  %v1096_v35 = vmin.f32 %v2344_v32, 0.0  ;;  %v1153_v0 = vmul.f32 1.442695, %v1098_v42 }
 0x2a8   :  { %1283 = vst [vmem:[#allocation2 + $0x80] sm:$0xff] %v1251_v30  ;;  %v1254_v13 = vsel %vm1222_vm6, %v2307_v10, %v1352_v31  ;;  %v1350_v9 = vadd.f32 -1.0, %v1705_v63  ;;  %1716 = vpow2.f32 %v1147_v8  ;;  %vm1208_vm12 = vcmp.gt.f32.partialorder %v2327_v2, 0.0 }
 0x2a9   :  { %1286 = vst [vmem:[#allocation2 + $0x98] sm:$0xff] %v1254_v13  ;;  %v1149_v41 = vmul.f32 1.442695, %v1096_v35  ;;  %1718 = vpow2.f32 %v1153_v0  ;;  %vm1223_vm13 = vcmp.gt.f32.partialorder %v2329_v15, 0.0  ;;  %vm1226_vm14 = vcmp.gt.f32.partialorder %v2334_v18, 0.0 }
 0x2aa   :  { %v1252_v1 = vsel %vm1220_vm7, %v2310_v52, %v1350_v9  ;;  %vm1224_vm15 = vcmp.gt.f32.partialorder %v2344_v32, 0.0 }
 0x2ab   :  { %1284 = vst [vmem:[#allocation2 + $0x88] sm:$0xff] %v1252_v1  ;;  %v2356_v46 = vpop.f32.mrf.mxu0  ;;  %1720 = vpow2.f32 %v1149_v41 }
 0x2ac   :  { %v1085_v43 = vmin.f32 %v2356_v46, 0.0  ;;  %vm1213_vm0 = vcmp.gt.f32.partialorder %v2356_v46, 0.0 }
 0x2ad   :  { %v1707_v36 = vpop.eup %1706  ;;  %v2359_v25 = vpop.f32.mrf.mxu0 }
 0x2ae   :  { %v1339_v62 = vadd.f32 -1.0, %v1707_v36  ;;  %v1127_v22 = vmul.f32 1.442695, %v1085_v43  ;;  %v1083_v12 = vmin.f32 %v2359_v25, 0.0  ;;  %vm1211_vm1 = vcmp.gt.f32.partialorder %v2359_v25, 0.0 }
 0x2af   :  { %v1709_v61 = vpop.eup %1708  ;;  %v2363_v10 = vpop.f32.mrf.mxu0 }
 0x2b0   :  { %v2365_v51 = vpop.f32.mrf.mxu1  ;;  %v1241_v54 = vsel %vm1209_vm8, %v2313_v21, %v1339_v62  ;;  %v1337_v23 = vadd.f32 -1.0, %v1709_v61  ;;  %1722 = vpow2.f32 %v1127_v22  ;;  %v1123_v52 = vmul.f32 1.442695, %v1083_v12 }
 0x2b1   :  { %1273 = vst [vmem:[#allocation2 + $0x30] sm:$0xff] %v1241_v54  ;;  %v1086_v34 = vmin.f32 %v2363_v10, 0.0  ;;  %v1101_v20 = vmin.f32 %v2365_v51, 0.0  ;;  %v2372_v28 = vpop.f32.mrf.mxu0  ;;  %vm1214_vm2 = vcmp.gt.f32.partialorder %v2363_v10, 0.0  ;;  %vm1229_vm3 = vcmp.gt.f32.partialorder %v2365_v51, 0.0 }
 0x2b2   :  { %v2374_v11 = vpop.f32.mrf.mxu1  ;;  %v1711_v37 = vpop.eup %1710  ;;  %v1239_v16 = vsel %vm1207_vm9, %v2316_v50, %v1337_v23  ;;  %1724 = vpow2.f32 %v1123_v52  ;;  %v1084_v21 = vmin.f32 %v2372_v28, 0.0  ;;  %vm1212_vm4 = vcmp.gt.f32.partialorder %v2372_v28, 0.0 }
 0x2b3   :  { %v1713_v27 = vpop.eup %1712  ;;  %1271 = vst [vmem:[#allocation2 + $0x20] sm:$0xff] %v1239_v16  ;;  %v1340_v39 = vadd.f32 -1.0, %v1711_v37  ;;  %v1129_v6 = vmul.f32 1.442695, %v1086_v34  ;;  %v1159_v5 = vmul.f32 1.442695, %v1101_v20 }
 0x2b4   :  { %v1099_v53 = vmin.f32 %v2374_v11, 0.0  ;;  %v2380_v7 = vpop.f32.mrf.mxu1  ;;  %v1715_v29 = vpop.eup %1714  ;;  %v1355_v26 = vadd.f32 -1.0, %v1713_v27  ;;  %v1125_v47 = vmul.f32 1.442695, %v1084_v21  ;;  %vm1227_vm5 = vcmp.gt.f32.partialorder %v2374_v11, 0.0 }
 0x2b5   :  { %v1102_v50 = vmin.f32 %v2380_v7, 0.0  ;;  %v1717_v48 = vpop.eup %1716  ;;  %v1242_v40 = vsel %vm1210_vm10, %v2319_v38, %v1340_v39  ;;  %v1338_v56 = vadd.f32 -1.0, %v1715_v29  ;;  %1726 = vpow2.f32 %v1129_v6 }
 0x2b6   :  { %v1155_v3 = vmul.f32 1.442695, %v1099_v53  ;;  %v2387_v14 = vpop.f32.mrf.mxu1  ;;  %1274 = vst [vmem:[#allocation2 + $0x38] sm:$0xff] %v1242_v40  ;;  %v1257_v24 = vsel %vm1225_vm11, %v2321_v4, %v1355_v26  ;;  %v1353_v57 = vadd.f32 -1.0, %v1717_v48  ;;  %1728 = vpow2.f32 %v1159_v5  ;;  %v1719_v55 = vpop.eup %1718 }
 0x2b7   :  { %v1161_v58 = vmul.f32 1.442695, %v1102_v50  ;;  %1289 = vst [vmem:[#allocation2 + $0xb0] sm:$0xff] %v1257_v24  ;;  %v1240_v44 = vsel %vm1208_vm12, %v2327_v2, %v1338_v56  ;;  %1730 = vpow2.f32 %v1125_v47  ;;  %v1100_v38 = vmin.f32 %v2387_v14, 0.0 }
 0x2b8   :  { %1272 = vst [vmem:[#allocation2 + $0x28] sm:$0xff] %v1240_v44  ;;  %v1255_v17 = vsel %vm1223_vm13, %v2329_v15, %v1353_v57  ;;  %1732 = vpow2.f32 %v1155_v3  ;;  %v1721_v49 = vpop.eup %1720  ;;  %v1356_v33 = vadd.f32 -1.0, %v1719_v55  ;;  %vm1230_vm6 = vcmp.gt.f32.partialorder %v2380_v7, 0.0 }
 0x2b9   :  { %1287 = vst [vmem:[#allocation2 + $0xa0] sm:$0xff] %v1255_v17  ;;  %1734 = vpow2.f32 %v1161_v58  ;;  %v1157_v4 = vmul.f32 1.442695, %v1100_v38  ;;  %v1354_v45 = vadd.f32 -1.0, %v1721_v49  ;;  %vm1228_vm7 = vcmp.gt.f32.partialorder %v2387_v14, 0.0 }
 0x2ba   :  { %v1258_v2 = vsel %vm1226_vm14, %v2334_v18, %v1356_v33 }
 0x2bb   :  { %1736 = vpow2.f32 %v1157_v4  ;;  %v2399_v19 = vpop.f32.mrf.mxu0  ;;  %1290 = vst [vmem:[#allocation2 + $0xb8] sm:$0xff] %v1258_v2  ;;  %v1256_v59 = vsel %vm1224_vm15, %v2344_v32, %v1354_v45 }
 0x2bc   :  { %v1089_v15 = vmin.f32 %v2399_v19, 0.0  ;;  %1288 = vst [vmem:[#allocation2 + $0xa8] sm:$0xff] %v1256_v59  ;;  %vm1217_vm8 = vcmp.gt.f32.partialorder %v2399_v19, 0.0 }
 0x2bd   :  { %v1723_v60 = vpop.eup %1722  ;;  %v2403_v31 = vpop.f32.mrf.mxu0 }
 0x2be   :  { %v1343_v8 = vadd.f32 -1.0, %v1723_v60  ;;  %v1135_v63 = vmul.f32 1.442695, %v1089_v15  ;;  %v1087_v30 = vmin.f32 %v2403_v31, 0.0  ;;  %vm1215_vm9 = vcmp.gt.f32.partialorder %v2403_v31, 0.0 }
 0x2bf   :  { %v2406_v42 = vpop.f32.mrf.mxu1  ;;  %v1725_v18 = vpop.eup %1724 }
 0x2c0   :  { %v2410_v13 = vpop.f32.mrf.mxu0  ;;  %v1105_v32 = vmin.f32 %v2406_v42, 0.0  ;;  %v1245_v9 = vsel %vm1213_vm0, %v2356_v46, %v1343_v8  ;;  %v1341_v35 = vadd.f32 -1.0, %v1725_v18  ;;  %1738 = vpow2.f32 %v1135_v63 }
 0x2c1   :  { %v1131_v0 = vmul.f32 1.442695, %v1087_v30  ;;  %v2414_v1 = vpop.f32.mrf.mxu1  ;;  %1277 = vst [vmem:[#allocation2 + $0x50] sm:$0xff] %v1245_v9  ;;  %v1090_v41 = vmin.f32 %v2410_v13, 0.0  ;;  %vm1233_vm10 = vcmp.gt.f32.partialorder %v2406_v42, 0.0  ;;  %vm1218_vm11 = vcmp.gt.f32.partialorder %v2410_v13, 0.0 }
 0x2c2   :  { %v1167_v43 = vmul.f32 1.442695, %v1105_v32  ;;  %v2418_v36 = vpop.f32.mrf.mxu0  ;;  %v1103_v62 = vmin.f32 %v2414_v1, 0.0  ;;  %v1727_v22 = vpop.eup %1726  ;;  %v1243_v12 = vsel %vm1211_vm1, %v2359_v25, %v1341_v35  ;;  %vm1231_vm13 = vcmp.gt.f32.partialorder %v2414_v1, 0.0 }
 0x2c3   :  { %1740 = vpow2.f32 %v1131_v0  ;;  %v1088_v46 = vmin.f32 %v2418_v36, 0.0  ;;  %v2424_v61 = vpop.f32.mrf.mxu1  ;;  %v1729_v54 = vpop.eup %1728  ;;  %1275 = vst [vmem:[#allocation2 + $0x40] sm:$0xff] %v1243_v12  ;;  %v1344_v23 = vadd.f32 -1.0, %v1727_v22  ;;  %v1137_v52 = vmul.f32 1.442695, %v1090_v41 }
 0x2c4   :  { %1742 = vpow2.f32 %v1167_v43  ;;  %v1163_v34 = vmul.f32 1.442695, %v1103_v62  ;;  %v1731_v20 = vpop.eup %1730  ;;  %v1359_v37 = vadd.f32 -1.0, %v1729_v54  ;;  %v1106_v25 = vmin.f32 %v2424_v61, 0.0 }
 0x2c5   :  { %v1133_v16 = vmul.f32 1.442695, %v1088_v46  ;;  %v2428_v21 = vpop.f32.mrf.mxu1  ;;  %v1733_v27 = vpop.eup %1732  ;;  %v1246_v39 = vsel %vm1214_vm2, %v2363_v10, %v1344_v23  ;;  %v1342_v6 = vadd.f32 -1.0, %v1731_v20  ;;  %1744 = vpow2.f32 %v1137_v52 }
 0x2c6   :  { %v1735_v5 = vpop.eup %1734  ;;  %1278 = vst [vmem:[#allocation2 + $0x58] sm:$0xff] %v1246_v39  ;;  %v1261_v53 = vsel %vm1229_vm3, %v2365_v51, %v1359_v37  ;;  %v1357_v29 = vadd.f32 -1.0, %v1733_v27  ;;  %v1169_v26 = vmul.f32 1.442695, %v1106_v25  ;;  %v1104_v10 = vmin.f32 %v2428_v21, 0.0 }
 0x2c7   :  { %1746 = vpow2.f32 %v1133_v16  ;;  %1293 = vst [vmem:[#allocation2 + $0xd0] sm:$0xff] %v1261_v53  ;;  %v1244_v47 = vsel %vm1212_vm4, %v2372_v28, %v1342_v6  ;;  %v1360_v50 = vadd.f32 -1.0, %v1735_v5  ;;  %vm1216_vm12 = vcmp.gt.f32.partialorder %v2418_v36, 0.0 }
 0x2c8   :  { %1748 = vpow2.f32 %v1163_v34  ;;  %v1737_v48 = vpop.eup %1736  ;;  %1276 = vst [vmem:[#allocation2 + $0x48] sm:$0xff] %v1244_v47  ;;  %v1259_v40 = vsel %vm1227_vm5, %v2374_v11, %v1357_v29  ;;  %v1165_v3 = vmul.f32 1.442695, %v1104_v10  ;;  %vm1234_vm14 = vcmp.gt.f32.partialorder %v2424_v61, 0.0 }
 0x2c9   :  { %1750 = vpow2.f32 %v1169_v26  ;;  %1291 = vst [vmem:[#allocation2 + $0xc0] sm:$0xff] %v1259_v40  ;;  %v1262_v51 = vsel %vm1230_vm6, %v2380_v7, %v1360_v50  ;;  %v1358_v56 = vadd.f32 -1.0, %v1737_v48  ;;  %vm1232_vm15 = vcmp.gt.f32.partialorder %v2428_v21, 0.0 }
 0x2ca   :  { %1294 = vst [vmem:[#allocation2 + $0xd8] sm:$0xff] %v1262_v51  ;;  %1752 = vpow2.f32 %v1165_v3 }
 0x2cb   :  { %v1260_v28 = vsel %vm1228_vm7, %v2387_v14, %v1358_v56 }
 0x2cc   :  { %1292 = vst [vmem:[#allocation2 + $0xc8] sm:$0xff] %v1260_v28 }
 0x2cd   :  { %v1739_v24 = vpop.eup %1738 }
 0x2ce   :  { %v1347_v57 = vadd.f32 -1.0, %v1739_v24 }
 0x2d0   :  { %v1741_v58 = vpop.eup %1740  ;;  %v1249_v44 = vsel %vm1217_vm8, %v2399_v19, %v1347_v57 }
 0x2d1   :  { %v1743_v11 = vpop.eup %1742  ;;  %v1345_v38 = vadd.f32 -1.0, %v1741_v58  ;;  %1281 = vst [vmem:[#allocation2 + $0x70] sm:$0xff] %v1249_v44 }
 0x2d2   :  { %v1363_v7 = vadd.f32 -1.0, %v1743_v11  ;;  %v1745_v55 = vpop.eup %1744 }
 0x2d3   :  { %v1247_v17 = vsel %vm1215_vm9, %v2403_v31, %v1345_v38  ;;  %v1348_v49 = vadd.f32 -1.0, %v1745_v55 }
 0x2d4   :  { %v1747_v14 = vpop.eup %1746  ;;  %1279 = vst [vmem:[#allocation2 + $0x60] sm:$0xff] %v1247_v17  ;;  %v1265_v33 = vsel %vm1233_vm10, %v2406_v42, %v1363_v7 }
 0x2d5   :  { %v1749_v4 = vpop.eup %1748  ;;  %1297 = vst [vmem:[#allocation2 + $0xf0] sm:$0xff] %v1265_v33  ;;  %v1346_v45 = vadd.f32 -1.0, %v1747_v14  ;;  %v1250_v19 = vsel %vm1218_vm11, %v2410_v13, %v1348_v49 }
 0x2d6   :  { %v1751_v2 = vpop.eup %1750  ;;  %v1361_v59 = vadd.f32 -1.0, %v1749_v4  ;;  %1282 = vst [vmem:[#allocation2 + $0x78] sm:$0xff] %v1250_v19 }
 0x2d7   :  { %v1248_v15 = vsel %vm1216_vm12, %v2418_v36, %v1346_v45  ;;  %v1364_v60 = vadd.f32 -1.0, %v1751_v2  ;;  %v1753_v8 = vpop.eup %1752 }
 0x2d8   :  { %1280 = vst [vmem:[#allocation2 + $0x68] sm:$0xff] %v1248_v15  ;;  %v1263_v31 = vsel %vm1231_vm13, %v2414_v1, %v1361_v59  ;;  %v1362_v30 = vadd.f32 -1.0, %v1753_v8 }
 0x2d9   :  { %1295 = vst [vmem:[#allocation2 + $0xe0] sm:$0xff] %v1263_v31  ;;  %v1266_v63 = vsel %vm1234_vm14, %v2424_v61, %v1364_v60 }
 0x2da   :  { %1298 = vst [vmem:[#allocation2 + $0xf8] sm:$0xff] %v1266_v63  ;;  %v1264_v42 = vsel %vm1232_vm15, %v2428_v21, %v1362_v30 }
 0x2db   :  { %1296 = vst [vmem:[#allocation2 + $0xe8] sm:$0xff] %v1264_v42 }
 0x2dc   :  { %1765 = shalt.err (!%p1762_p4)
}
 0x2dd   :  { %s1778_s11 = smov 128   ;;  %s1779_s12 = smov 8  }
 0x2de   :  { %1310 = dma.vmem_to_hbm [thread:$0]  %s1305_s9, 4096, %s2469_s4, [#allocation3], %s1778_s11, %s1778_s11, %s1779_s12  }
 0x2df   :  { %1774 = dma.done.wait [#allocation3], 4096  }
 0x2e0   :  { %1775 = vsyncadd [#allocation3], 4294963200 }
 0x2e1   :  { %1314 = vsyncpa [#allocation3], 1 }

</bundles_post_ra>
